<compile_context>
chip_gen: v5e
topology: v5e:2x2
jax: 0.10.0
libtpu: 0.0.40
codegen_flags: <defaults>
</compile_context>

<pallas_src>
import jax
import jax.numpy as jnp
from jax.experimental import pallas as pl
from jax.experimental.pallas import tpu as pltpu


def make_lstm_kernel(num_layers, seq_len, hidden_dim):
    L, T, H = num_layers, seq_len, hidden_dim

    def kernel(x_ref, len_ref, w_ih0_ref, w_hh0_ref, *rest):
        # rest layout:
        #   [0 : L-1]        w_cat[l]  (2H, 4H) bf16   stacked [W_ih; W_hh], layers 1..L-1
        #   [L-1 : 2L-1]     bias[l]   (1, 4H)  f32    b_ih + b_hh, per layer
        #   [2L-1]           w_fc      (H, O)   bf16
        #   [2L]             b_fc      (1, O)   f32
        #   [2L+1]           out       (BT, O)  f32
        #   [2L+2]           xp_scr    (T, BT, 4H) f32 VMEM scratch
        w_cat_refs = rest[0:L - 1]
        bias_refs = rest[L - 1:2 * L - 1]
        w_fc_ref = rest[2 * L - 1]
        b_fc_ref = rest[2 * L]
        out_ref = rest[2 * L + 1]
        xp_scr = rest[2 * L + 2]

        BT = out_ref.shape[0]

        # ---- layer-0 input projection for ALL timesteps: one well-shaped MXU matmul ----
        x2d = x_ref[...].reshape(T * BT, -1).astype(jnp.bfloat16)          # (T*BT, D)
        xp = jnp.dot(x2d, w_ih0_ref[...], preferred_element_type=jnp.float32)
        xp = xp + bias_refs[0][...]            # fold layer-0 bias once (single broadcast)
        xp_scr[...] = xp.reshape(T, BT, 4 * H)

        # ---- hoist weight loads / bias broadcasts out of the time loop ----
        w_hh0 = w_hh0_ref[...]                                             # (H, 4H) bf16
        w_cat = [r[...] for r in w_cat_refs]                               # (2H, 4H) bf16
        bias_b = [jnp.broadcast_to(bias_refs[l][...], (BT, 4 * H)) for l in range(1, L)]
        lens = len_ref[...]                                                # (BT, 1) int32

        def lstm_cell(gates, h_prev, c_prev, mask):
            # Whole-tile nonlinearities, then slice (PyTorch gate order: i, f, g, o).
            sig_all = jax.nn.sigmoid(gates)
            tanh_all = jnp.tanh(gates)
            i_g = sig_all[:, 0 * H:1 * H]
            f_g = sig_all[:, 1 * H:2 * H]
            g_g = tanh_all[:, 2 * H:3 * H]
            o_g = sig_all[:, 3 * H:4 * H]
            c_new = f_g * c_prev + i_g * g_g
            h_new = o_g * jnp.tanh(c_new)
            # Hold state for padded steps -> final h equals h at last valid step (= hn).
            h_upd = jnp.where(mask, h_new, h_prev)
            c_upd = jnp.where(mask, c_new, c_prev)
            return h_upd, c_upd

        def step(t, carry):
            h, c = carry                                   # tuples of (BT, H) f32
            mask = lens > t                                # (BT, 1) bool
            # Layer 0: input projection precomputed; only the recurrent matmul remains.
            gates0 = xp_scr[t] + jnp.dot(h[0].astype(jnp.bfloat16), w_hh0,
                                         preferred_element_type=jnp.float32)
            h0, c0 = lstm_cell(gates0, h[0], c[0], mask)
            new_h, new_c = [h0], [c0]
            inp = h0
            for l in range(1, L):
                # Fused [inp, h_prev] @ [W_ih; W_hh]: one MXU push per layer per step.
                xh = jnp.concatenate([inp, h[l]], axis=-1).astype(jnp.bfloat16)
                gates = (jnp.dot(xh, w_cat[l - 1], preferred_element_type=jnp.float32)
                         + bias_b[l - 1])
                hl, cl = lstm_cell(gates, h[l], c[l], mask)
                new_h.append(hl)
                new_c.append(cl)
                inp = hl
            return tuple(new_h), tuple(new_c)

        zeros = tuple(jnp.zeros((BT, H), jnp.float32) for _ in range(L))
        h_fin, _ = jax.lax.fori_loop(0, T, step, (zeros, zeros), unroll=True)

        out_ref[...] = (jnp.dot(h_fin[L - 1].astype(jnp.bfloat16), w_fc_ref[...],
                                preferred_element_type=jnp.float32)
                        + b_fc_ref[...]).astype(out_ref.dtype)

    return kernel


def lstm_model_forward(x, x_lengths, params, *, batch_tile=None):
    """x: (B, T, D) float32; x_lengths: (B,) int; returns (B, output_dim) float32."""
    B, T, D = x.shape
    L = len(params["w_ih_t"])
    H = params["w_hh_t"][0].shape[0]
    O = params["w_fc_t"].shape[1]

    # Batch tiling: a "parallel" grid axis so large batches shard across v7x's 2 TCs.
    # At the toy demo size this is a single grid step.
    if batch_tile is None:
        batch_tile = B // 2 if (B % 16 == 0) else B
    BT = batch_tile
    assert B % BT == 0 and BT % 8 == 0

    cdt = jnp.bfloat16   # MXU operand dtype; accumulation & all elementwise math stay f32

    # Time-major so each batch tile's full sequence is a single resident VMEM block.
    x_tm = jnp.transpose(x, (1, 0, 2))                       # (T, B, D)
    lens = x_lengths.astype(jnp.int32).reshape(B, 1)         # (B, 1)

    w_ih0 = params["w_ih_t"][0].astype(cdt)                  # (D, 4H)
    w_hh0 = params["w_hh_t"][0].astype(cdt)                  # (H, 4H)
    w_cat = [jnp.concatenate([params["w_ih_t"][l], params["w_hh_t"][l]],
                             axis=0).astype(cdt) for l in range(1, L)]   # (2H, 4H)
    biases = list(params["bias"])                            # (1, 4H) f32
    w_fc = params["w_fc_t"].astype(cdt)                      # (H, O)
    b_fc = params["b_fc"]                                    # (1, O)  f32

    def resident(shape):
        return pl.BlockSpec(shape, lambda b, _n=len(shape): (0,) * _n)

    inputs = [x_tm, lens, w_ih0, w_hh0, *w_cat, *biases, w_fc, b_fc]
    in_specs = [
        pl.BlockSpec((T, BT, D), lambda b: (0, b, 0)),       # whole sequence, one batch tile
        pl.BlockSpec((BT, 1), lambda b: (b, 0)),             # lengths
        resident(w_ih0.shape),
        resident(w_hh0.shape),
        *[resident(w.shape) for w in w_cat],
        *[resident(b.shape) for b in biases],
        resident(w_fc.shape),
        resident(b_fc.shape),
    ]
    # NOTE: at large H/L on v7x (64 MiB VMEM) keep weights single-buffered / raise
    # vmem_limit_bytes via CompilerParams; irrelevant at these sizes.

    kernel = make_lstm_kernel(L, T, H)
    return pl.pallas_call(
        kernel,
        out_shape=jax.ShapeDtypeStruct((B, O), jnp.float32),
        grid=(B // BT,),
        in_specs=in_specs,
        out_specs=pl.BlockSpec((BT, O), lambda b: (b, 0)),
        scratch_shapes=[pltpu.VMEM((T, BT, 4 * H), jnp.float32)],
        compiler_params=pltpu.CompilerParams(dimension_semantics=("parallel",)),
    )(*inputs)


def init_params(key, input_dim, hidden_dim, layer_dim, output_dim):
    """Deterministic init matching nn.LSTM / nn.Linear parameter shapes (f32 master copy)."""
    k = 1.0 / float(hidden_dim) ** 0.5
    keys = jax.random.split(key, 4 * layer_dim + 2)
    params = {"w_ih_t": [], "w_hh_t": [], "bias": []}
    idx = 0
    for l in range(layer_dim):
        in_d = input_dim if l == 0 else hidden_dim
        w_ih = jax.random.uniform(keys[idx], (4 * hidden_dim, in_d),
                                  minval=-k, maxval=k, dtype=jnp.float32); idx += 1
        w_hh = jax.random.uniform(keys[idx], (4 * hidden_dim, hidden_dim),
                                  minval=-k, maxval=k, dtype=jnp.float32); idx += 1
        b_ih = jax.random.uniform(keys[idx], (4 * hidden_dim,),
                                  minval=-k, maxval=k, dtype=jnp.float32); idx += 1
        b_hh = jax.random.uniform(keys[idx], (4 * hidden_dim,),
                                  minval=-k, maxval=k, dtype=jnp.float32); idx += 1
        params["w_ih_t"].append(w_ih.T)                           # (D_in, 4H)
        params["w_hh_t"].append(w_hh.T)                           # (H, 4H)
        params["bias"].append((b_ih + b_hh).reshape(1, 4 * hidden_dim))
    w_fc = jax.random.uniform(keys[idx], (output_dim, hidden_dim),
                              minval=-k, maxval=k, dtype=jnp.float32); idx += 1
    b_fc = jax.random.uniform(keys[idx], (output_dim,),
                              minval=-k, maxval=k, dtype=jnp.float32)
    params["w_fc_t"] = w_fc.T                                     # (H, O)
    params["b_fc"] = b_fc.reshape(1, output_dim)
    return params


def lstm_model_ref(x, x_lengths, params):
    """Pure-JAX f32 reference with the PyTorch packed-sequence (masked hold) semantics."""
    B, T, _ = x.shape
    L = len(params["w_ih_t"])
    H = params["w_hh_t"][0].shape[0]
    h = [jnp.zeros((B, H), jnp.float32) for _ in range(L)]
    c = [jnp.zeros((B, H), jnp.float32) for _ in range(L)]
    for t in range(T):
        mask = (x_lengths > t)[:, None]
        inp = x[:, t, :]
        for l in range(L):
            gates = inp @ params["w_ih_t"][l] + h[l] @ params["w_hh_t"][l] + params["bias"][l]
            i_g = jax.nn.sigmoid(gates[:, :H])
            f_g = jax.nn.sigmoid(gates[:, H:2 * H])
            g_g = jnp.tanh(gates[:, 2 * H:3 * H])
            o_g = jax.nn.sigmoid(gates[:, 3 * H:])
            c_new = f_g * c[l] + i_g * g_g
            h_new = o_g * jnp.tanh(c_new)
            h[l] = jnp.where(mask, h_new, h[l])
            c[l] = jnp.where(mask, c_new, c[l])
            inp = h[l]
    return h[-1] @ params["w_fc_t"] + params["b_fc"]


if __name__ == "__main__":
    B, T, D, H, L, O = 8, 8, 16, 32, 2, 8   # batch, seq, input_dim, hidden_dim, layers, output_dim
    key = jax.random.PRNGKey(0)
    kx, kp = jax.random.split(key)
    x = jax.random.normal(kx, (B, T, D), dtype=jnp.float32)
    x_lengths = jnp.array([8, 5, 3, 8, 1, 7, 2, 6], dtype=jnp.int32)
    params = init_params(kp, D, H, L, O)

    out = lstm_model_forward(x, x_lengths, params)
    out = jax.block_until_ready(out)

    ref = lstm_model_ref(x, x_lengths, params)
    assert out.shape == (B, O)
    # Tolerance loosened for bf16 MXU operands (accumulation and state remain f32).
    assert jnp.allclose(out, ref, atol=3e-2, rtol=3e-2), float(jnp.max(jnp.abs(out - ref)))
    print("KERNEL_OK")
</pallas_src>

<mosaic_0001>
module attributes {stable_mosaic.version = 11 : i64} {
  func.func @kernel(%arg0: i32, %arg1: memref<8x8x16xf32, #tpu.memory_space<vmem>>, %arg2: memref<8x1xi32, #tpu.memory_space<vmem>>, %arg3: memref<16x128xbf16, #tpu.memory_space<vmem>>, %arg4: memref<32x128xbf16, #tpu.memory_space<vmem>>, %arg5: memref<64x128xbf16, #tpu.memory_space<vmem>>, %arg6: memref<1x128xf32, #tpu.memory_space<vmem>>, %arg7: memref<1x128xf32, #tpu.memory_space<vmem>>, %arg8: memref<32x8xbf16, #tpu.memory_space<vmem>>, %arg9: memref<1x8xf32, #tpu.memory_space<vmem>>, %arg10: memref<8x8xf32, #tpu.memory_space<vmem>>, %arg11: memref<8x8x128xf32, #tpu.memory_space<vmem>>) attributes {dimension_semantics = [#tpu.dimension_semantics<parallel>], iteration_bounds = array<i64: 1>, scalar_prefetch = 0 : i64, scratch_operands = 1 : i64, tpu.core_type = #tpu.core_type<tc>, window_params = [{transform_indices = @transform_0, window_bounds = array<i64: 8, 8, 16>}, {transform_indices = @transform_1, window_bounds = array<i64: 8, 1>}, {pipeline_mode = #tpu.pipeline_mode<synchronous>, transform_indices = @transform_2, window_bounds = array<i64: 16, 128>}, {pipeline_mode = #tpu.pipeline_mode<synchronous>, transform_indices = @transform_3, window_bounds = array<i64: 32, 128>}, {pipeline_mode = #tpu.pipeline_mode<synchronous>, transform_indices = @transform_4, window_bounds = array<i64: 64, 128>}, {pipeline_mode = #tpu.pipeline_mode<synchronous>, transform_indices = @transform_5, window_bounds = array<i64: 1, 128>}, {pipeline_mode = #tpu.pipeline_mode<synchronous>, transform_indices = @transform_6, window_bounds = array<i64: 1, 128>}, {pipeline_mode = #tpu.pipeline_mode<synchronous>, transform_indices = @transform_7, window_bounds = array<i64: 32, 8>}, {pipeline_mode = #tpu.pipeline_mode<synchronous>, transform_indices = @transform_8, window_bounds = array<i64: 1, 8>}, {transform_indices = @transform_9, window_bounds = array<i64: 8, 8>}]} {
    %c0 = arith.constant 0 : index
    %c0_0 = arith.constant 0 : index
    %c0_1 = arith.constant 0 : index
    %0 = vector.load %arg1[%c0, %c0_0, %c0_1] : memref<8x8x16xf32, #tpu.memory_space<vmem>>, vector<8x8x16xf32>
    %1 = vector.shape_cast %0 : vector<8x8x16xf32> to vector<64x16xf32>
    %2 = arith.truncf %1 : vector<64x16xf32> to vector<64x16xbf16>
    %c0_2 = arith.constant 0 : index
    %c0_3 = arith.constant 0 : index
    %3 = vector.load %arg3[%c0_2, %c0_3] : memref<16x128xbf16, #tpu.memory_space<vmem>>, vector<16x128xbf16>
    %cst = arith.constant dense<0.000000e+00> : vector<64x128xf32>
    %4 = tpu.matmul %2, %3, %cst {dimension_numbers = #tpu.dot_dimension_numbers<[1], [0], [0], [1], [0, 0, 1, 1], [], []>} : vector<64x16xbf16>, vector<16x128xbf16>, vector<64x128xf32> -> vector<64x128xf32>
    %c0_4 = arith.constant 0 : index
    %c0_5 = arith.constant 0 : index
    %5 = vector.load %arg6[%c0_4, %c0_5] : memref<1x128xf32, #tpu.memory_space<vmem>>, vector<1x128xf32>
    %6 = vector.broadcast %5 : vector<1x128xf32> to vector<64x128xf32>
    %7 = arith.addf %4, %6 : vector<64x128xf32>
    %8 = vector.shape_cast %7 : vector<64x128xf32> to vector<8x8x128xf32>
    %c0_6 = arith.constant 0 : index
    %c0_7 = arith.constant 0 : index
    %c0_8 = arith.constant 0 : index
    %9 = vector.load %arg11[%c0_6, %c0_7, %c0_8] : memref<8x8x128xf32, #tpu.memory_space<vmem>>, vector<8x8x128xf32>
    tpu.vector_store %arg11[%c0_6, %c0_7, %c0_8], %8 {strides = array<i32>} : memref<8x8x128xf32, #tpu.memory_space<vmem>>, vector<8x8x128xf32>,
    %c0_9 = arith.constant 0 : index
    %c0_10 = arith.constant 0 : index
    %10 = vector.load %arg4[%c0_9, %c0_10] : memref<32x128xbf16, #tpu.memory_space<vmem>>, vector<32x128xbf16>
    %c0_11 = arith.constant 0 : index
    %c0_12 = arith.constant 0 : index
    %11 = vector.load %arg5[%c0_11, %c0_12] : memref<64x128xbf16, #tpu.memory_space<vmem>>, vector<64x128xbf16>
    %c0_13 = arith.constant 0 : index
    %c0_14 = arith.constant 0 : index
    %12 = vector.load %arg7[%c0_13, %c0_14] : memref<1x128xf32, #tpu.memory_space<vmem>>, vector<1x128xf32>
    %13 = vector.shape_cast %12 : vector<1x128xf32> to vector<1x128xf32>
    %14 = vector.broadcast %13 : vector<1x128xf32> to vector<8x128xf32>
    %c0_15 = arith.constant 0 : index
    %c0_16 = arith.constant 0 : index
    %15 = vector.load %arg2[%c0_15, %c0_16] : memref<8x1xi32, #tpu.memory_space<vmem>>, vector<8x1xi32>
    %cst_17 = arith.constant 0.000000e+00 : f32
    %16 = vector.broadcast %cst_17 : f32 to vector<8x32xf32>
    %cst_18 = arith.constant 0.000000e+00 : f32
    %17 = vector.broadcast %cst_18 : f32 to vector<8x32xf32>
    %c0_i32 = arith.constant 0 : i32
    %18 = vector.broadcast %c0_i32 : i32 to vector<8x1xi32>
    %19 = arith.cmpi sgt, %15, %18 : vector<8x1xi32>
    %20 = arith.index_cast %c0_i32 : i32 to index
    %c0_19 = arith.constant 0 : index
    %c0_20 = arith.constant 0 : index
    %21 = vector.load %arg11[%20, %c0_19, %c0_20] : memref<8x8x128xf32, #tpu.memory_space<vmem>>, vector<1x8x128xf32>
    %22 = vector.shape_cast %21 : vector<1x8x128xf32> to vector<8x128xf32>
    %23 = arith.truncf %16 : vector<8x32xf32> to vector<8x32xbf16>
    %cst_21 = arith.constant dense<0.000000e+00> : vector<8x128xf32>
    %24 = tpu.matmul %23, %10, %cst_21 {dimension_numbers = #tpu.dot_dimension_numbers<[1], [0], [0], [1], [0, 0, 1, 1], [], []>} : vector<8x32xbf16>, vector<32x128xbf16>, vector<8x128xf32> -> vector<8x128xf32>
    %25 = arith.addf %22, %24 : vector<8x128xf32>
    %26 = arith.negf %25 : vector<8x128xf32>
    %27 = math.exp %26 : vector<8x128xf32>
    %cst_22 = arith.constant 1.000000e+00 : f32
    %28 = vector.broadcast %cst_22 : f32 to vector<8x128xf32>
    %29 = arith.addf %28, %27 : vector<8x128xf32>
    %30 = arith.divf %28, %29 : vector<8x128xf32>
    %31 = math.tanh %25 : vector<8x128xf32>
    %32 = vector.extract_strided_slice %30 {offsets = [0, 0], sizes = [8, 32], strides = [1, 1]} : vector<8x128xf32> to vector<8x32xf32>
    %33 = vector.extract_strided_slice %30 {offsets = [0, 32], sizes = [8, 32], strides = [1, 1]} : vector<8x128xf32> to vector<8x32xf32>
    %34 = vector.extract_strided_slice %31 {offsets = [0, 64], sizes = [8, 32], strides = [1, 1]} : vector<8x128xf32> to vector<8x32xf32>
    %35 = vector.extract_strided_slice %30 {offsets = [0, 96], sizes = [8, 32], strides = [1, 1]} : vector<8x128xf32> to vector<8x32xf32>
    %36 = arith.mulf %33, %16 : vector<8x32xf32>
    %37 = arith.mulf %32, %34 : vector<8x32xf32>
    %38 = arith.addf %36, %37 : vector<8x32xf32>
    %39 = math.tanh %38 : vector<8x32xf32>
    %40 = arith.mulf %35, %39 : vector<8x32xf32>
    %41 = vector.shape_cast %19 : vector<8x1xi1> to vector<8x1xi1>
    %42 = vector.broadcast %41 : vector<8x1xi1> to vector<8x32xi1>
    %43 = arith.select %42, %40, %16 : vector<8x32xi1>, vector<8x32xf32>
    %44 = vector.shape_cast %19 : vector<8x1xi1> to vector<8x1xi1>
    %45 = vector.broadcast %44 : vector<8x1xi1> to vector<8x32xi1>
    %46 = arith.select %45, %38, %16 : vector<8x32xi1>, vector<8x32xf32>
    %47 = tpu.concatenate %43, %17 in 1 : vector<8x32xf32>, vector<8x32xf32> -> vector<8x64xf32>
    %48 = arith.truncf %47 : vector<8x64xf32> to vector<8x64xbf16>
    %cst_23 = arith.constant dense<0.000000e+00> : vector<8x128xf32>
    %49 = tpu.matmul %48, %11, %cst_23 {dimension_numbers = #tpu.dot_dimension_numbers<[1], [0], [0], [1], [0, 0, 1, 1], [], []>} : vector<8x64xbf16>, vector<64x128xbf16>, vector<8x128xf32> -> vector<8x128xf32>
    %50 = arith.addf %49, %14 : vector<8x128xf32>
    %51 = arith.negf %50 : vector<8x128xf32>
    %52 = math.exp %51 : vector<8x128xf32>
    %cst_24 = arith.constant 1.000000e+00 : f32
    %53 = vector.broadcast %cst_24 : f32 to vector<8x128xf32>
    %54 = arith.addf %53, %52 : vector<8x128xf32>
    %55 = arith.divf %53, %54 : vector<8x128xf32>
    %56 = math.tanh %50 : vector<8x128xf32>
    %57 = vector.extract_strided_slice %55 {offsets = [0, 0], sizes = [8, 32], strides = [1, 1]} : vector<8x128xf32> to vector<8x32xf32>
    %58 = vector.extract_strided_slice %55 {offsets = [0, 32], sizes = [8, 32], strides = [1, 1]} : vector<8x128xf32> to vector<8x32xf32>
    %59 = vector.extract_strided_slice %56 {offsets = [0, 64], sizes = [8, 32], strides = [1, 1]} : vector<8x128xf32> to vector<8x32xf32>
    %60 = vector.extract_strided_slice %55 {offsets = [0, 96], sizes = [8, 32], strides = [1, 1]} : vector<8x128xf32> to vector<8x32xf32>
    %61 = arith.mulf %58, %17 : vector<8x32xf32>
    %62 = arith.mulf %57, %59 : vector<8x32xf32>
    %63 = arith.addf %61, %62 : vector<8x32xf32>
    %64 = math.tanh %63 : vector<8x32xf32>
    %65 = arith.mulf %60, %64 : vector<8x32xf32>
    %66 = vector.shape_cast %19 : vector<8x1xi1> to vector<8x1xi1>
    %67 = vector.broadcast %66 : vector<8x1xi1> to vector<8x32xi1>
    %68 = arith.select %67, %65, %17 : vector<8x32xi1>, vector<8x32xf32>
    %69 = vector.shape_cast %19 : vector<8x1xi1> to vector<8x1xi1>
    %70 = vector.broadcast %69 : vector<8x1xi1> to vector<8x32xi1>
    %71 = arith.select %70, %63, %17 : vector<8x32xi1>, vector<8x32xf32>
    %c1_i32 = arith.constant 1 : i32
    %72 = vector.broadcast %c1_i32 : i32 to vector<8x1xi32>
    %73 = arith.cmpi sgt, %15, %72 : vector<8x1xi32>
    %74 = arith.index_cast %c1_i32 : i32 to index
    %c0_25 = arith.constant 0 : index
    %c0_26 = arith.constant 0 : index
    %75 = vector.load %arg11[%74, %c0_25, %c0_26] : memref<8x8x128xf32, #tpu.memory_space<vmem>>, vector<1x8x128xf32>
    %76 = vector.shape_cast %75 : vector<1x8x128xf32> to vector<8x128xf32>
    %77 = arith.truncf %43 : vector<8x32xf32> to vector<8x32xbf16>
    %cst_27 = arith.constant dense<0.000000e+00> : vector<8x128xf32>
    %78 = tpu.matmul %77, %10, %cst_27 {dimension_numbers = #tpu.dot_dimension_numbers<[1], [0], [0], [1], [0, 0, 1, 1], [], []>} : vector<8x32xbf16>, vector<32x128xbf16>, vector<8x128xf32> -> vector<8x128xf32>
    %79 = arith.addf %76, %78 : vector<8x128xf32>
    %80 = arith.negf %79 : vector<8x128xf32>
    %81 = math.exp %80 : vector<8x128xf32>
    %cst_28 = arith.constant 1.000000e+00 : f32
    %82 = vector.broadcast %cst_28 : f32 to vector<8x128xf32>
    %83 = arith.addf %82, %81 : vector<8x128xf32>
    %84 = arith.divf %82, %83 : vector<8x128xf32>
    %85 = math.tanh %79 : vector<8x128xf32>
    %86 = vector.extract_strided_slice %84 {offsets = [0, 0], sizes = [8, 32], strides = [1, 1]} : vector<8x128xf32> to vector<8x32xf32>
    %87 = vector.extract_strided_slice %84 {offsets = [0, 32], sizes = [8, 32], strides = [1, 1]} : vector<8x128xf32> to vector<8x32xf32>
    %88 = vector.extract_strided_slice %85 {offsets = [0, 64], sizes = [8, 32], strides = [1, 1]} : vector<8x128xf32> to vector<8x32xf32>
    %89 = vector.extract_strided_slice %84 {offsets = [0, 96], sizes = [8, 32], strides = [1, 1]} : vector<8x128xf32> to vector<8x32xf32>
    %90 = arith.mulf %87, %46 : vector<8x32xf32>
    %91 = arith.mulf %86, %88 : vector<8x32xf32>
    %92 = arith.addf %90, %91 : vector<8x32xf32>
    %93 = math.tanh %92 : vector<8x32xf32>
    %94 = arith.mulf %89, %93 : vector<8x32xf32>
    %95 = vector.shape_cast %73 : vector<8x1xi1> to vector<8x1xi1>
    %96 = vector.broadcast %95 : vector<8x1xi1> to vector<8x32xi1>
    %97 = arith.select %96, %94, %43 : vector<8x32xi1>, vector<8x32xf32>
    %98 = vector.shape_cast %73 : vector<8x1xi1> to vector<8x1xi1>
    %99 = vector.broadcast %98 : vector<8x1xi1> to vector<8x32xi1>
    %100 = arith.select %99, %92, %46 : vector<8x32xi1>, vector<8x32xf32>
    %101 = tpu.concatenate %97, %68 in 1 : vector<8x32xf32>, vector<8x32xf32> -> vector<8x64xf32>
    %102 = arith.truncf %101 : vector<8x64xf32> to vector<8x64xbf16>
    %cst_29 = arith.constant dense<0.000000e+00> : vector<8x128xf32>
    %103 = tpu.matmul %102, %11, %cst_29 {dimension_numbers = #tpu.dot_dimension_numbers<[1], [0], [0], [1], [0, 0, 1, 1], [], []>} : vector<8x64xbf16>, vector<64x128xbf16>, vector<8x128xf32> -> vector<8x128xf32>
    %104 = arith.addf %103, %14 : vector<8x128xf32>
    %105 = arith.negf %104 : vector<8x128xf32>
    %106 = math.exp %105 : vector<8x128xf32>
    %cst_30 = arith.constant 1.000000e+00 : f32
    %107 = vector.broadcast %cst_30 : f32 to vector<8x128xf32>
    %108 = arith.addf %107, %106 : vector<8x128xf32>
    %109 = arith.divf %107, %108 : vector<8x128xf32>
    %110 = math.tanh %104 : vector<8x128xf32>
    %111 = vector.extract_strided_slice %109 {offsets = [0, 0], sizes = [8, 32], strides = [1, 1]} : vector<8x128xf32> to vector<8x32xf32>
    %112 = vector.extract_strided_slice %109 {offsets = [0, 32], sizes = [8, 32], strides = [1, 1]} : vector<8x128xf32> to vector<8x32xf32>
    %113 = vector.extract_strided_slice %110 {offsets = [0, 64], sizes = [8, 32], strides = [1, 1]} : vector<8x128xf32> to vector<8x32xf32>
    %114 = vector.extract_strided_slice %109 {offsets = [0, 96], sizes = [8, 32], strides = [1, 1]} : vector<8x128xf32> to vector<8x32xf32>
    %115 = arith.mulf %112, %71 : vector<8x32xf32>
    %116 = arith.mulf %111, %113 : vector<8x32xf32>
    %117 = arith.addf %115, %116 : vector<8x32xf32>
    %118 = math.tanh %117 : vector<8x32xf32>
    %119 = arith.mulf %114, %118 : vector<8x32xf32>
    %120 = vector.shape_cast %73 : vector<8x1xi1> to vector<8x1xi1>
    %121 = vector.broadcast %120 : vector<8x1xi1> to vector<8x32xi1>
    %122 = arith.select %121, %119, %68 : vector<8x32xi1>, vector<8x32xf32>
    %123 = vector.shape_cast %73 : vector<8x1xi1> to vector<8x1xi1>
    %124 = vector.broadcast %123 : vector<8x1xi1> to vector<8x32xi1>
    %125 = arith.select %124, %117, %71 : vector<8x32xi1>, vector<8x32xf32>
    %c2_i32 = arith.constant 2 : i32
    %126 = vector.broadcast %c2_i32 : i32 to vector<8x1xi32>
    %127 = arith.cmpi sgt, %15, %126 : vector<8x1xi32>
    %128 = arith.index_cast %c2_i32 : i32 to index
    %c0_31 = arith.constant 0 : index
    %c0_32 = arith.constant 0 : index
    %129 = vector.load %arg11[%128, %c0_31, %c0_32] : memref<8x8x128xf32, #tpu.memory_space<vmem>>, vector<1x8x128xf32>
    %130 = vector.shape_cast %129 : vector<1x8x128xf32> to vector<8x128xf32>
    %131 = arith.truncf %97 : vector<8x32xf32> to vector<8x32xbf16>
    %cst_33 = arith.constant dense<0.000000e+00> : vector<8x128xf32>
    %132 = tpu.matmul %131, %10, %cst_33 {dimension_numbers = #tpu.dot_dimension_numbers<[1], [0], [0], [1], [0, 0, 1, 1], [], []>} : vector<8x32xbf16>, vector<32x128xbf16>, vector<8x128xf32> -> vector<8x128xf32>
    %133 = arith.addf %130, %132 : vector<8x128xf32>
    %134 = arith.negf %133 : vector<8x128xf32>
    %135 = math.exp %134 : vector<8x128xf32>
    %cst_34 = arith.constant 1.000000e+00 : f32
    %136 = vector.broadcast %cst_34 : f32 to vector<8x128xf32>
    %137 = arith.addf %136, %135 : vector<8x128xf32>
    %138 = arith.divf %136, %137 : vector<8x128xf32>
    %139 = math.tanh %133 : vector<8x128xf32>
    %140 = vector.extract_strided_slice %138 {offsets = [0, 0], sizes = [8, 32], strides = [1, 1]} : vector<8x128xf32> to vector<8x32xf32>
    %141 = vector.extract_strided_slice %138 {offsets = [0, 32], sizes = [8, 32], strides = [1, 1]} : vector<8x128xf32> to vector<8x32xf32>
    %142 = vector.extract_strided_slice %139 {offsets = [0, 64], sizes = [8, 32], strides = [1, 1]} : vector<8x128xf32> to vector<8x32xf32>
    %143 = vector.extract_strided_slice %138 {offsets = [0, 96], sizes = [8, 32], strides = [1, 1]} : vector<8x128xf32> to vector<8x32xf32>
    %144 = arith.mulf %141, %100 : vector<8x32xf32>
    %145 = arith.mulf %140, %142 : vector<8x32xf32>
    %146 = arith.addf %144, %145 : vector<8x32xf32>
    %147 = math.tanh %146 : vector<8x32xf32>
    %148 = arith.mulf %143, %147 : vector<8x32xf32>
    %149 = vector.shape_cast %127 : vector<8x1xi1> to vector<8x1xi1>
    %150 = vector.broadcast %149 : vector<8x1xi1> to vector<8x32xi1>
    %151 = arith.select %150, %148, %97 : vector<8x32xi1>, vector<8x32xf32>
    %152 = vector.shape_cast %127 : vector<8x1xi1> to vector<8x1xi1>
    %153 = vector.broadcast %152 : vector<8x1xi1> to vector<8x32xi1>
    %154 = arith.select %153, %146, %100 : vector<8x32xi1>, vector<8x32xf32>
    %155 = tpu.concatenate %151, %122 in 1 : vector<8x32xf32>, vector<8x32xf32> -> vector<8x64xf32>
    %156 = arith.truncf %155 : vector<8x64xf32> to vector<8x64xbf16>
    %cst_35 = arith.constant dense<0.000000e+00> : vector<8x128xf32>
    %157 = tpu.matmul %156, %11, %cst_35 {dimension_numbers = #tpu.dot_dimension_numbers<[1], [0], [0], [1], [0, 0, 1, 1], [], []>} : vector<8x64xbf16>, vector<64x128xbf16>, vector<8x128xf32> -> vector<8x128xf32>
    %158 = arith.addf %157, %14 : vector<8x128xf32>
    %159 = arith.negf %158 : vector<8x128xf32>
    %160 = math.exp %159 : vector<8x128xf32>
    %cst_36 = arith.constant 1.000000e+00 : f32
    %161 = vector.broadcast %cst_36 : f32 to vector<8x128xf32>
    %162 = arith.addf %161, %160 : vector<8x128xf32>
    %163 = arith.divf %161, %162 : vector<8x128xf32>
    %164 = math.tanh %158 : vector<8x128xf32>
    %165 = vector.extract_strided_slice %163 {offsets = [0, 0], sizes = [8, 32], strides = [1, 1]} : vector<8x128xf32> to vector<8x32xf32>
    %166 = vector.extract_strided_slice %163 {offsets = [0, 32], sizes = [8, 32], strides = [1, 1]} : vector<8x128xf32> to vector<8x32xf32>
    %167 = vector.extract_strided_slice %164 {offsets = [0, 64], sizes = [8, 32], strides = [1, 1]} : vector<8x128xf32> to vector<8x32xf32>
    %168 = vector.extract_strided_slice %163 {offsets = [0, 96], sizes = [8, 32], strides = [1, 1]} : vector<8x128xf32> to vector<8x32xf32>
    %169 = arith.mulf %166, %125 : vector<8x32xf32>
    %170 = arith.mulf %165, %167 : vector<8x32xf32>
    %171 = arith.addf %169, %170 : vector<8x32xf32>
    %172 = math.tanh %171 : vector<8x32xf32>
    %173 = arith.mulf %168, %172 : vector<8x32xf32>
    %174 = vector.shape_cast %127 : vector<8x1xi1> to vector<8x1xi1>
    %175 = vector.broadcast %174 : vector<8x1xi1> to vector<8x32xi1>
    %176 = arith.select %175, %173, %122 : vector<8x32xi1>, vector<8x32xf32>
    %177 = vector.shape_cast %127 : vector<8x1xi1> to vector<8x1xi1>
    %178 = vector.broadcast %177 : vector<8x1xi1> to vector<8x32xi1>
    %179 = arith.select %178, %171, %125 : vector<8x32xi1>, vector<8x32xf32>
    %c3_i32 = arith.constant 3 : i32
    %180 = vector.broadcast %c3_i32 : i32 to vector<8x1xi32>
    %181 = arith.cmpi sgt, %15, %180 : vector<8x1xi32>
    %182 = arith.index_cast %c3_i32 : i32 to index
    %c0_37 = arith.constant 0 : index
    %c0_38 = arith.constant 0 : index
    %183 = vector.load %arg11[%182, %c0_37, %c0_38] : memref<8x8x128xf32, #tpu.memory_space<vmem>>, vector<1x8x128xf32>
    %184 = vector.shape_cast %183 : vector<1x8x128xf32> to vector<8x128xf32>
    %185 = arith.truncf %151 : vector<8x32xf32> to vector<8x32xbf16>
    %cst_39 = arith.constant dense<0.000000e+00> : vector<8x128xf32>
    %186 = tpu.matmul %185, %10, %cst_39 {dimension_numbers = #tpu.dot_dimension_numbers<[1], [0], [0], [1], [0, 0, 1, 1], [], []>} : vector<8x32xbf16>, vector<32x128xbf16>, vector<8x128xf32> -> vector<8x128xf32>
    %187 = arith.addf %184, %186 : vector<8x128xf32>
    %188 = arith.negf %187 : vector<8x128xf32>
    %189 = math.exp %188 : vector<8x128xf32>
    %cst_40 = arith.constant 1.000000e+00 : f32
    %190 = vector.broadcast %cst_40 : f32 to vector<8x128xf32>
    %191 = arith.addf %190, %189 : vector<8x128xf32>
    %192 = arith.divf %190, %191 : vector<8x128xf32>
    %193 = math.tanh %187 : vector<8x128xf32>
    %194 = vector.extract_strided_slice %192 {offsets = [0, 0], sizes = [8, 32], strides = [1, 1]} : vector<8x128xf32> to vector<8x32xf32>
    %195 = vector.extract_strided_slice %192 {offsets = [0, 32], sizes = [8, 32], strides = [1, 1]} : vector<8x128xf32> to vector<8x32xf32>
    %196 = vector.extract_strided_slice %193 {offsets = [0, 64], sizes = [8, 32], strides = [1, 1]} : vector<8x128xf32> to vector<8x32xf32>
    %197 = vector.extract_strided_slice %192 {offsets = [0, 96], sizes = [8, 32], strides = [1, 1]} : vector<8x128xf32> to vector<8x32xf32>
    %198 = arith.mulf %195, %154 : vector<8x32xf32>
    %199 = arith.mulf %194, %196 : vector<8x32xf32>
    %200 = arith.addf %198, %199 : vector<8x32xf32>
    %201 = math.tanh %200 : vector<8x32xf32>
    %202 = arith.mulf %197, %201 : vector<8x32xf32>
    %203 = vector.shape_cast %181 : vector<8x1xi1> to vector<8x1xi1>
    %204 = vector.broadcast %203 : vector<8x1xi1> to vector<8x32xi1>
    %205 = arith.select %204, %202, %151 : vector<8x32xi1>, vector<8x32xf32>
    %206 = vector.shape_cast %181 : vector<8x1xi1> to vector<8x1xi1>
    %207 = vector.broadcast %206 : vector<8x1xi1> to vector<8x32xi1>
    %208 = arith.select %207, %200, %154 : vector<8x32xi1>, vector<8x32xf32>
    %209 = tpu.concatenate %205, %176 in 1 : vector<8x32xf32>, vector<8x32xf32> -> vector<8x64xf32>
    %210 = arith.truncf %209 : vector<8x64xf32> to vector<8x64xbf16>
    %cst_41 = arith.constant dense<0.000000e+00> : vector<8x128xf32>
    %211 = tpu.matmul %210, %11, %cst_41 {dimension_numbers = #tpu.dot_dimension_numbers<[1], [0], [0], [1], [0, 0, 1, 1], [], []>} : vector<8x64xbf16>, vector<64x128xbf16>, vector<8x128xf32> -> vector<8x128xf32>
    %212 = arith.addf %211, %14 : vector<8x128xf32>
    %213 = arith.negf %212 : vector<8x128xf32>
    %214 = math.exp %213 : vector<8x128xf32>
    %cst_42 = arith.constant 1.000000e+00 : f32
    %215 = vector.broadcast %cst_42 : f32 to vector<8x128xf32>
    %216 = arith.addf %215, %214 : vector<8x128xf32>
    %217 = arith.divf %215, %216 : vector<8x128xf32>
    %218 = math.tanh %212 : vector<8x128xf32>
    %219 = vector.extract_strided_slice %217 {offsets = [0, 0], sizes = [8, 32], strides = [1, 1]} : vector<8x128xf32> to vector<8x32xf32>
    %220 = vector.extract_strided_slice %217 {offsets = [0, 32], sizes = [8, 32], strides = [1, 1]} : vector<8x128xf32> to vector<8x32xf32>
    %221 = vector.extract_strided_slice %218 {offsets = [0, 64], sizes = [8, 32], strides = [1, 1]} : vector<8x128xf32> to vector<8x32xf32>
    %222 = vector.extract_strided_slice %217 {offsets = [0, 96], sizes = [8, 32], strides = [1, 1]} : vector<8x128xf32> to vector<8x32xf32>
    %223 = arith.mulf %220, %179 : vector<8x32xf32>
    %224 = arith.mulf %219, %221 : vector<8x32xf32>
    %225 = arith.addf %223, %224 : vector<8x32xf32>
    %226 = math.tanh %225 : vector<8x32xf32>
    %227 = arith.mulf %222, %226 : vector<8x32xf32>
    %228 = vector.shape_cast %181 : vector<8x1xi1> to vector<8x1xi1>
    %229 = vector.broadcast %228 : vector<8x1xi1> to vector<8x32xi1>
    %230 = arith.select %229, %227, %176 : vector<8x32xi1>, vector<8x32xf32>
    %231 = vector.shape_cast %181 : vector<8x1xi1> to vector<8x1xi1>
    %232 = vector.broadcast %231 : vector<8x1xi1> to vector<8x32xi1>
    %233 = arith.select %232, %225, %179 : vector<8x32xi1>, vector<8x32xf32>
    %c4_i32 = arith.constant 4 : i32
    %234 = vector.broadcast %c4_i32 : i32 to vector<8x1xi32>
    %235 = arith.cmpi sgt, %15, %234 : vector<8x1xi32>
    %236 = arith.index_cast %c4_i32 : i32 to index
    %c0_43 = arith.constant 0 : index
    %c0_44 = arith.constant 0 : index
    %237 = vector.load %arg11[%236, %c0_43, %c0_44] : memref<8x8x128xf32, #tpu.memory_space<vmem>>, vector<1x8x128xf32>
    %238 = vector.shape_cast %237 : vector<1x8x128xf32> to vector<8x128xf32>
    %239 = arith.truncf %205 : vector<8x32xf32> to vector<8x32xbf16>
    %cst_45 = arith.constant dense<0.000000e+00> : vector<8x128xf32>
    %240 = tpu.matmul %239, %10, %cst_45 {dimension_numbers = #tpu.dot_dimension_numbers<[1], [0], [0], [1], [0, 0, 1, 1], [], []>} : vector<8x32xbf16>, vector<32x128xbf16>, vector<8x128xf32> -> vector<8x128xf32>
    %241 = arith.addf %238, %240 : vector<8x128xf32>
    %242 = arith.negf %241 : vector<8x128xf32>
    %243 = math.exp %242 : vector<8x128xf32>
    %cst_46 = arith.constant 1.000000e+00 : f32
    %244 = vector.broadcast %cst_46 : f32 to vector<8x128xf32>
    %245 = arith.addf %244, %243 : vector<8x128xf32>
    %246 = arith.divf %244, %245 : vector<8x128xf32>
    %247 = math.tanh %241 : vector<8x128xf32>
    %248 = vector.extract_strided_slice %246 {offsets = [0, 0], sizes = [8, 32], strides = [1, 1]} : vector<8x128xf32> to vector<8x32xf32>
    %249 = vector.extract_strided_slice %246 {offsets = [0, 32], sizes = [8, 32], strides = [1, 1]} : vector<8x128xf32> to vector<8x32xf32>
    %250 = vector.extract_strided_slice %247 {offsets = [0, 64], sizes = [8, 32], strides = [1, 1]} : vector<8x128xf32> to vector<8x32xf32>
    %251 = vector.extract_strided_slice %246 {offsets = [0, 96], sizes = [8, 32], strides = [1, 1]} : vector<8x128xf32> to vector<8x32xf32>
    %252 = arith.mulf %249, %208 : vector<8x32xf32>
    %253 = arith.mulf %248, %250 : vector<8x32xf32>
    %254 = arith.addf %252, %253 : vector<8x32xf32>
    %255 = math.tanh %254 : vector<8x32xf32>
    %256 = arith.mulf %251, %255 : vector<8x32xf32>
    %257 = vector.shape_cast %235 : vector<8x1xi1> to vector<8x1xi1>
    %258 = vector.broadcast %257 : vector<8x1xi1> to vector<8x32xi1>
    %259 = arith.select %258, %256, %205 : vector<8x32xi1>, vector<8x32xf32>
    %260 = vector.shape_cast %235 : vector<8x1xi1> to vector<8x1xi1>
    %261 = vector.broadcast %260 : vector<8x1xi1> to vector<8x32xi1>
    %262 = arith.select %261, %254, %208 : vector<8x32xi1>, vector<8x32xf32>
    %263 = tpu.concatenate %259, %230 in 1 : vector<8x32xf32>, vector<8x32xf32> -> vector<8x64xf32>
    %264 = arith.truncf %263 : vector<8x64xf32> to vector<8x64xbf16>
    %cst_47 = arith.constant dense<0.000000e+00> : vector<8x128xf32>
    %265 = tpu.matmul %264, %11, %cst_47 {dimension_numbers = #tpu.dot_dimension_numbers<[1], [0], [0], [1], [0, 0, 1, 1], [], []>} : vector<8x64xbf16>, vector<64x128xbf16>, vector<8x128xf32> -> vector<8x128xf32>
    %266 = arith.addf %265, %14 : vector<8x128xf32>
    %267 = arith.negf %266 : vector<8x128xf32>
    %268 = math.exp %267 : vector<8x128xf32>
    %cst_48 = arith.constant 1.000000e+00 : f32
    %269 = vector.broadcast %cst_48 : f32 to vector<8x128xf32>
    %270 = arith.addf %269, %268 : vector<8x128xf32>
    %271 = arith.divf %269, %270 : vector<8x128xf32>
    %272 = math.tanh %266 : vector<8x128xf32>
    %273 = vector.extract_strided_slice %271 {offsets = [0, 0], sizes = [8, 32], strides = [1, 1]} : vector<8x128xf32> to vector<8x32xf32>
    %274 = vector.extract_strided_slice %271 {offsets = [0, 32], sizes = [8, 32], strides = [1, 1]} : vector<8x128xf32> to vector<8x32xf32>
    %275 = vector.extract_strided_slice %272 {offsets = [0, 64], sizes = [8, 32], strides = [1, 1]} : vector<8x128xf32> to vector<8x32xf32>
    %276 = vector.extract_strided_slice %271 {offsets = [0, 96], sizes = [8, 32], strides = [1, 1]} : vector<8x128xf32> to vector<8x32xf32>
    %277 = arith.mulf %274, %233 : vector<8x32xf32>
    %278 = arith.mulf %273, %275 : vector<8x32xf32>
    %279 = arith.addf %277, %278 : vector<8x32xf32>
    %280 = math.tanh %279 : vector<8x32xf32>
    %281 = arith.mulf %276, %280 : vector<8x32xf32>
    %282 = vector.shape_cast %235 : vector<8x1xi1> to vector<8x1xi1>
    %283 = vector.broadcast %282 : vector<8x1xi1> to vector<8x32xi1>
    %284 = arith.select %283, %281, %230 : vector<8x32xi1>, vector<8x32xf32>
    %285 = vector.shape_cast %235 : vector<8x1xi1> to vector<8x1xi1>
    %286 = vector.broadcast %285 : vector<8x1xi1> to vector<8x32xi1>
    %287 = arith.select %286, %279, %233 : vector<8x32xi1>, vector<8x32xf32>
    %c5_i32 = arith.constant 5 : i32
    %288 = vector.broadcast %c5_i32 : i32 to vector<8x1xi32>
    %289 = arith.cmpi sgt, %15, %288 : vector<8x1xi32>
    %290 = arith.index_cast %c5_i32 : i32 to index
    %c0_49 = arith.constant 0 : index
    %c0_50 = arith.constant 0 : index
    %291 = vector.load %arg11[%290, %c0_49, %c0_50] : memref<8x8x128xf32, #tpu.memory_space<vmem>>, vector<1x8x128xf32>
    %292 = vector.shape_cast %291 : vector<1x8x128xf32> to vector<8x128xf32>
    %293 = arith.truncf %259 : vector<8x32xf32> to vector<8x32xbf16>
    %cst_51 = arith.constant dense<0.000000e+00> : vector<8x128xf32>
    %294 = tpu.matmul %293, %10, %cst_51 {dimension_numbers = #tpu.dot_dimension_numbers<[1], [0], [0], [1], [0, 0, 1, 1], [], []>} : vector<8x32xbf16>, vector<32x128xbf16>, vector<8x128xf32> -> vector<8x128xf32>
    %295 = arith.addf %292, %294 : vector<8x128xf32>
    %296 = arith.negf %295 : vector<8x128xf32>
    %297 = math.exp %296 : vector<8x128xf32>
    %cst_52 = arith.constant 1.000000e+00 : f32
    %298 = vector.broadcast %cst_52 : f32 to vector<8x128xf32>
    %299 = arith.addf %298, %297 : vector<8x128xf32>
    %300 = arith.divf %298, %299 : vector<8x128xf32>
    %301 = math.tanh %295 : vector<8x128xf32>
    %302 = vector.extract_strided_slice %300 {offsets = [0, 0], sizes = [8, 32], strides = [1, 1]} : vector<8x128xf32> to vector<8x32xf32>
    %303 = vector.extract_strided_slice %300 {offsets = [0, 32], sizes = [8, 32], strides = [1, 1]} : vector<8x128xf32> to vector<8x32xf32>
    %304 = vector.extract_strided_slice %301 {offsets = [0, 64], sizes = [8, 32], strides = [1, 1]} : vector<8x128xf32> to vector<8x32xf32>
    %305 = vector.extract_strided_slice %300 {offsets = [0, 96], sizes = [8, 32], strides = [1, 1]} : vector<8x128xf32> to vector<8x32xf32>
    %306 = arith.mulf %303, %262 : vector<8x32xf32>
    %307 = arith.mulf %302, %304 : vector<8x32xf32>
    %308 = arith.addf %306, %307 : vector<8x32xf32>
    %309 = math.tanh %308 : vector<8x32xf32>
    %310 = arith.mulf %305, %309 : vector<8x32xf32>
    %311 = vector.shape_cast %289 : vector<8x1xi1> to vector<8x1xi1>
    %312 = vector.broadcast %311 : vector<8x1xi1> to vector<8x32xi1>
    %313 = arith.select %312, %310, %259 : vector<8x32xi1>, vector<8x32xf32>
    %314 = vector.shape_cast %289 : vector<8x1xi1> to vector<8x1xi1>
    %315 = vector.broadcast %314 : vector<8x1xi1> to vector<8x32xi1>
    %316 = arith.select %315, %308, %262 : vector<8x32xi1>, vector<8x32xf32>
    %317 = tpu.concatenate %313, %284 in 1 : vector<8x32xf32>, vector<8x32xf32> -> vector<8x64xf32>
    %318 = arith.truncf %317 : vector<8x64xf32> to vector<8x64xbf16>
    %cst_53 = arith.constant dense<0.000000e+00> : vector<8x128xf32>
    %319 = tpu.matmul %318, %11, %cst_53 {dimension_numbers = #tpu.dot_dimension_numbers<[1], [0], [0], [1], [0, 0, 1, 1], [], []>} : vector<8x64xbf16>, vector<64x128xbf16>, vector<8x128xf32> -> vector<8x128xf32>
    %320 = arith.addf %319, %14 : vector<8x128xf32>
    %321 = arith.negf %320 : vector<8x128xf32>
    %322 = math.exp %321 : vector<8x128xf32>
    %cst_54 = arith.constant 1.000000e+00 : f32
    %323 = vector.broadcast %cst_54 : f32 to vector<8x128xf32>
    %324 = arith.addf %323, %322 : vector<8x128xf32>
    %325 = arith.divf %323, %324 : vector<8x128xf32>
    %326 = math.tanh %320 : vector<8x128xf32>
    %327 = vector.extract_strided_slice %325 {offsets = [0, 0], sizes = [8, 32], strides = [1, 1]} : vector<8x128xf32> to vector<8x32xf32>
    %328 = vector.extract_strided_slice %325 {offsets = [0, 32], sizes = [8, 32], strides = [1, 1]} : vector<8x128xf32> to vector<8x32xf32>
    %329 = vector.extract_strided_slice %326 {offsets = [0, 64], sizes = [8, 32], strides = [1, 1]} : vector<8x128xf32> to vector<8x32xf32>
    %330 = vector.extract_strided_slice %325 {offsets = [0, 96], sizes = [8, 32], strides = [1, 1]} : vector<8x128xf32> to vector<8x32xf32>
    %331 = arith.mulf %328, %287 : vector<8x32xf32>
    %332 = arith.mulf %327, %329 : vector<8x32xf32>
    %333 = arith.addf %331, %332 : vector<8x32xf32>
    %334 = math.tanh %333 : vector<8x32xf32>
    %335 = arith.mulf %330, %334 : vector<8x32xf32>
    %336 = vector.shape_cast %289 : vector<8x1xi1> to vector<8x1xi1>
    %337 = vector.broadcast %336 : vector<8x1xi1> to vector<8x32xi1>
    %338 = arith.select %337, %335, %284 : vector<8x32xi1>, vector<8x32xf32>
    %339 = vector.shape_cast %289 : vector<8x1xi1> to vector<8x1xi1>
    %340 = vector.broadcast %339 : vector<8x1xi1> to vector<8x32xi1>
    %341 = arith.select %340, %333, %287 : vector<8x32xi1>, vector<8x32xf32>
    %c6_i32 = arith.constant 6 : i32
    %342 = vector.broadcast %c6_i32 : i32 to vector<8x1xi32>
    %343 = arith.cmpi sgt, %15, %342 : vector<8x1xi32>
    %344 = arith.index_cast %c6_i32 : i32 to index
    %c0_55 = arith.constant 0 : index
    %c0_56 = arith.constant 0 : index
    %345 = vector.load %arg11[%344, %c0_55, %c0_56] : memref<8x8x128xf32, #tpu.memory_space<vmem>>, vector<1x8x128xf32>
    %346 = vector.shape_cast %345 : vector<1x8x128xf32> to vector<8x128xf32>
    %347 = arith.truncf %313 : vector<8x32xf32> to vector<8x32xbf16>
    %cst_57 = arith.constant dense<0.000000e+00> : vector<8x128xf32>
    %348 = tpu.matmul %347, %10, %cst_57 {dimension_numbers = #tpu.dot_dimension_numbers<[1], [0], [0], [1], [0, 0, 1, 1], [], []>} : vector<8x32xbf16>, vector<32x128xbf16>, vector<8x128xf32> -> vector<8x128xf32>
    %349 = arith.addf %346, %348 : vector<8x128xf32>
    %350 = arith.negf %349 : vector<8x128xf32>
    %351 = math.exp %350 : vector<8x128xf32>
    %cst_58 = arith.constant 1.000000e+00 : f32
    %352 = vector.broadcast %cst_58 : f32 to vector<8x128xf32>
    %353 = arith.addf %352, %351 : vector<8x128xf32>
    %354 = arith.divf %352, %353 : vector<8x128xf32>
    %355 = math.tanh %349 : vector<8x128xf32>
    %356 = vector.extract_strided_slice %354 {offsets = [0, 0], sizes = [8, 32], strides = [1, 1]} : vector<8x128xf32> to vector<8x32xf32>
    %357 = vector.extract_strided_slice %354 {offsets = [0, 32], sizes = [8, 32], strides = [1, 1]} : vector<8x128xf32> to vector<8x32xf32>
    %358 = vector.extract_strided_slice %355 {offsets = [0, 64], sizes = [8, 32], strides = [1, 1]} : vector<8x128xf32> to vector<8x32xf32>
    %359 = vector.extract_strided_slice %354 {offsets = [0, 96], sizes = [8, 32], strides = [1, 1]} : vector<8x128xf32> to vector<8x32xf32>
    %360 = arith.mulf %357, %316 : vector<8x32xf32>
    %361 = arith.mulf %356, %358 : vector<8x32xf32>
    %362 = arith.addf %360, %361 : vector<8x32xf32>
    %363 = math.tanh %362 : vector<8x32xf32>
    %364 = arith.mulf %359, %363 : vector<8x32xf32>
    %365 = vector.shape_cast %343 : vector<8x1xi1> to vector<8x1xi1>
    %366 = vector.broadcast %365 : vector<8x1xi1> to vector<8x32xi1>
    %367 = arith.select %366, %364, %313 : vector<8x32xi1>, vector<8x32xf32>
    %368 = vector.shape_cast %343 : vector<8x1xi1> to vector<8x1xi1>
    %369 = vector.broadcast %368 : vector<8x1xi1> to vector<8x32xi1>
    %370 = arith.select %369, %362, %316 : vector<8x32xi1>, vector<8x32xf32>
    %371 = tpu.concatenate %367, %338 in 1 : vector<8x32xf32>, vector<8x32xf32> -> vector<8x64xf32>
    %372 = arith.truncf %371 : vector<8x64xf32> to vector<8x64xbf16>
    %cst_59 = arith.constant dense<0.000000e+00> : vector<8x128xf32>
    %373 = tpu.matmul %372, %11, %cst_59 {dimension_numbers = #tpu.dot_dimension_numbers<[1], [0], [0], [1], [0, 0, 1, 1], [], []>} : vector<8x64xbf16>, vector<64x128xbf16>, vector<8x128xf32> -> vector<8x128xf32>
    %374 = arith.addf %373, %14 : vector<8x128xf32>
    %375 = arith.negf %374 : vector<8x128xf32>
    %376 = math.exp %375 : vector<8x128xf32>
    %cst_60 = arith.constant 1.000000e+00 : f32
    %377 = vector.broadcast %cst_60 : f32 to vector<8x128xf32>
    %378 = arith.addf %377, %376 : vector<8x128xf32>
    %379 = arith.divf %377, %378 : vector<8x128xf32>
    %380 = math.tanh %374 : vector<8x128xf32>
    %381 = vector.extract_strided_slice %379 {offsets = [0, 0], sizes = [8, 32], strides = [1, 1]} : vector<8x128xf32> to vector<8x32xf32>
    %382 = vector.extract_strided_slice %379 {offsets = [0, 32], sizes = [8, 32], strides = [1, 1]} : vector<8x128xf32> to vector<8x32xf32>
    %383 = vector.extract_strided_slice %380 {offsets = [0, 64], sizes = [8, 32], strides = [1, 1]} : vector<8x128xf32> to vector<8x32xf32>
    %384 = vector.extract_strided_slice %379 {offsets = [0, 96], sizes = [8, 32], strides = [1, 1]} : vector<8x128xf32> to vector<8x32xf32>
    %385 = arith.mulf %382, %341 : vector<8x32xf32>
    %386 = arith.mulf %381, %383 : vector<8x32xf32>
    %387 = arith.addf %385, %386 : vector<8x32xf32>
    %388 = math.tanh %387 : vector<8x32xf32>
    %389 = arith.mulf %384, %388 : vector<8x32xf32>
    %390 = vector.shape_cast %343 : vector<8x1xi1> to vector<8x1xi1>
    %391 = vector.broadcast %390 : vector<8x1xi1> to vector<8x32xi1>
    %392 = arith.select %391, %389, %338 : vector<8x32xi1>, vector<8x32xf32>
    %393 = vector.shape_cast %343 : vector<8x1xi1> to vector<8x1xi1>
    %394 = vector.broadcast %393 : vector<8x1xi1> to vector<8x32xi1>
    %395 = arith.select %394, %387, %341 : vector<8x32xi1>, vector<8x32xf32>
    %c7_i32 = arith.constant 7 : i32
    %396 = vector.broadcast %c7_i32 : i32 to vector<8x1xi32>
    %397 = arith.cmpi sgt, %15, %396 : vector<8x1xi32>
    %398 = arith.index_cast %c7_i32 : i32 to index
    %c0_61 = arith.constant 0 : index
    %c0_62 = arith.constant 0 : index
    %399 = vector.load %arg11[%398, %c0_61, %c0_62] : memref<8x8x128xf32, #tpu.memory_space<vmem>>, vector<1x8x128xf32>
    %400 = vector.shape_cast %399 : vector<1x8x128xf32> to vector<8x128xf32>
    %401 = arith.truncf %367 : vector<8x32xf32> to vector<8x32xbf16>
    %cst_63 = arith.constant dense<0.000000e+00> : vector<8x128xf32>
    %402 = tpu.matmul %401, %10, %cst_63 {dimension_numbers = #tpu.dot_dimension_numbers<[1], [0], [0], [1], [0, 0, 1, 1], [], []>} : vector<8x32xbf16>, vector<32x128xbf16>, vector<8x128xf32> -> vector<8x128xf32>
    %403 = arith.addf %400, %402 : vector<8x128xf32>
    %404 = arith.negf %403 : vector<8x128xf32>
    %405 = math.exp %404 : vector<8x128xf32>
    %cst_64 = arith.constant 1.000000e+00 : f32
    %406 = vector.broadcast %cst_64 : f32 to vector<8x128xf32>
    %407 = arith.addf %406, %405 : vector<8x128xf32>
    %408 = arith.divf %406, %407 : vector<8x128xf32>
    %409 = math.tanh %403 : vector<8x128xf32>
    %410 = vector.extract_strided_slice %408 {offsets = [0, 0], sizes = [8, 32], strides = [1, 1]} : vector<8x128xf32> to vector<8x32xf32>
    %411 = vector.extract_strided_slice %408 {offsets = [0, 32], sizes = [8, 32], strides = [1, 1]} : vector<8x128xf32> to vector<8x32xf32>
    %412 = vector.extract_strided_slice %409 {offsets = [0, 64], sizes = [8, 32], strides = [1, 1]} : vector<8x128xf32> to vector<8x32xf32>
    %413 = vector.extract_strided_slice %408 {offsets = [0, 96], sizes = [8, 32], strides = [1, 1]} : vector<8x128xf32> to vector<8x32xf32>
    %414 = arith.mulf %411, %370 : vector<8x32xf32>
    %415 = arith.mulf %410, %412 : vector<8x32xf32>
    %416 = arith.addf %414, %415 : vector<8x32xf32>
    %417 = math.tanh %416 : vector<8x32xf32>
    %418 = arith.mulf %413, %417 : vector<8x32xf32>
    %419 = vector.shape_cast %397 : vector<8x1xi1> to vector<8x1xi1>
    %420 = vector.broadcast %419 : vector<8x1xi1> to vector<8x32xi1>
    %421 = arith.select %420, %418, %367 : vector<8x32xi1>, vector<8x32xf32>
    %422 = vector.shape_cast %397 : vector<8x1xi1> to vector<8x1xi1>
    %423 = vector.broadcast %422 : vector<8x1xi1> to vector<8x32xi1>
    %424 = arith.select %423, %416, %370 : vector<8x32xi1>, vector<8x32xf32>
    %425 = tpu.concatenate %421, %392 in 1 : vector<8x32xf32>, vector<8x32xf32> -> vector<8x64xf32>
    %426 = arith.truncf %425 : vector<8x64xf32> to vector<8x64xbf16>
    %cst_65 = arith.constant dense<0.000000e+00> : vector<8x128xf32>
    %427 = tpu.matmul %426, %11, %cst_65 {dimension_numbers = #tpu.dot_dimension_numbers<[1], [0], [0], [1], [0, 0, 1, 1], [], []>} : vector<8x64xbf16>, vector<64x128xbf16>, vector<8x128xf32> -> vector<8x128xf32>
    %428 = arith.addf %427, %14 : vector<8x128xf32>
    %429 = arith.negf %428 : vector<8x128xf32>
    %430 = math.exp %429 : vector<8x128xf32>
    %cst_66 = arith.constant 1.000000e+00 : f32
    %431 = vector.broadcast %cst_66 : f32 to vector<8x128xf32>
    %432 = arith.addf %431, %430 : vector<8x128xf32>
    %433 = arith.divf %431, %432 : vector<8x128xf32>
    %434 = math.tanh %428 : vector<8x128xf32>
    %435 = vector.extract_strided_slice %433 {offsets = [0, 0], sizes = [8, 32], strides = [1, 1]} : vector<8x128xf32> to vector<8x32xf32>
    %436 = vector.extract_strided_slice %433 {offsets = [0, 32], sizes = [8, 32], strides = [1, 1]} : vector<8x128xf32> to vector<8x32xf32>
    %437 = vector.extract_strided_slice %434 {offsets = [0, 64], sizes = [8, 32], strides = [1, 1]} : vector<8x128xf32> to vector<8x32xf32>
    %438 = vector.extract_strided_slice %433 {offsets = [0, 96], sizes = [8, 32], strides = [1, 1]} : vector<8x128xf32> to vector<8x32xf32>
    %439 = arith.mulf %436, %395 : vector<8x32xf32>
    %440 = arith.mulf %435, %437 : vector<8x32xf32>
    %441 = arith.addf %439, %440 : vector<8x32xf32>
    %442 = math.tanh %441 : vector<8x32xf32>
    %443 = arith.mulf %438, %442 : vector<8x32xf32>
    %444 = vector.shape_cast %397 : vector<8x1xi1> to vector<8x1xi1>
    %445 = vector.broadcast %444 : vector<8x1xi1> to vector<8x32xi1>
    %446 = arith.select %445, %443, %392 : vector<8x32xi1>, vector<8x32xf32>
    %447 = vector.shape_cast %397 : vector<8x1xi1> to vector<8x1xi1>
    %448 = vector.broadcast %447 : vector<8x1xi1> to vector<8x32xi1>
    %449 = arith.select %448, %441, %395 : vector<8x32xi1>, vector<8x32xf32>
    %c8_i32 = arith.constant 8 : i32
    %450 = arith.truncf %446 : vector<8x32xf32> to vector<8x32xbf16>
    %c0_67 = arith.constant 0 : index
    %c0_68 = arith.constant 0 : index
    %451 = vector.load %arg8[%c0_67, %c0_68] : memref<32x8xbf16, #tpu.memory_space<vmem>>, vector<32x8xbf16>
    %cst_69 = arith.constant dense<0.000000e+00> : vector<8x8xf32>
    %452 = tpu.matmul %450, %451, %cst_69 {dimension_numbers = #tpu.dot_dimension_numbers<[1], [0], [0], [1], [0, 0, 1, 1], [], []>} : vector<8x32xbf16>, vector<32x8xbf16>, vector<8x8xf32> -> vector<8x8xf32>
    %c0_70 = arith.constant 0 : index
    %c0_71 = arith.constant 0 : index
    %453 = vector.load %arg9[%c0_70, %c0_71] : memref<1x8xf32, #tpu.memory_space<vmem>>, vector<1x8xf32>
    %454 = vector.broadcast %453 : vector<1x8xf32> to vector<8x8xf32>
    %455 = arith.addf %452, %454 : vector<8x8xf32>
    %c0_72 = arith.constant 0 : index
    %c0_73 = arith.constant 0 : index
    %456 = vector.load %arg10[%c0_72, %c0_73] : memref<8x8xf32, #tpu.memory_space<vmem>>, vector<8x8xf32>
    tpu.vector_store %arg10[%c0_72, %c0_73], %455 {strides = array<i32>} : memref<8x8xf32, #tpu.memory_space<vmem>>, vector<8x8xf32>,
    return
  }
  func.func @transform_0(%arg0: i32) -> (i32, i32, i32) {
    %c0_i32 = arith.constant 0 : i32
    %c0_i32_0 = arith.constant 0 : i32
    %c0_i32_1 = arith.constant 0 : i32
    return %c0_i32, %arg0, %c0_i32_0 : i32, i32, i32
  }
  func.func @transform_1(%arg0: i32) -> (i32, i32) {
    %c0_i32 = arith.constant 0 : i32
    %c0_i32_0 = arith.constant 0 : i32
    return %arg0, %c0_i32 : i32, i32
  }
  func.func @transform_2(%arg0: i32) -> (i32, i32) {
    %c0_i32 = arith.constant 0 : i32
    %c0_i32_0 = arith.constant 0 : i32
    %c0_i32_1 = arith.constant 0 : i32
    return %c0_i32, %c0_i32_0 : i32, i32
  }
  func.func @transform_3(%arg0: i32) -> (i32, i32) {
    %c0_i32 = arith.constant 0 : i32
    %c0_i32_0 = arith.constant 0 : i32
    %c0_i32_1 = arith.constant 0 : i32
    return %c0_i32, %c0_i32_0 : i32, i32
  }
  func.func @transform_4(%arg0: i32) -> (i32, i32) {
    %c0_i32 = arith.constant 0 : i32
    %c0_i32_0 = arith.constant 0 : i32
    %c0_i32_1 = arith.constant 0 : i32
    return %c0_i32, %c0_i32_0 : i32, i32
  }
  func.func @transform_5(%arg0: i32) -> (i32, i32) {
    %c0_i32 = arith.constant 0 : i32
    %c0_i32_0 = arith.constant 0 : i32
    %c0_i32_1 = arith.constant 0 : i32
    return %c0_i32, %c0_i32_0 : i32, i32
  }
  func.func @transform_6(%arg0: i32) -> (i32, i32) {
    %c0_i32 = arith.constant 0 : i32
    %c0_i32_0 = arith.constant 0 : i32
    %c0_i32_1 = arith.constant 0 : i32
    return %c0_i32, %c0_i32_0 : i32, i32
  }
  func.func @transform_7(%arg0: i32) -> (i32, i32) {
    %c0_i32 = arith.constant 0 : i32
    %c0_i32_0 = arith.constant 0 : i32
    %c0_i32_1 = arith.constant 0 : i32
    return %c0_i32, %c0_i32_0 : i32, i32
  }
  func.func @transform_8(%arg0: i32) -> (i32, i32) {
    %c0_i32 = arith.constant 0 : i32
    %c0_i32_0 = arith.constant 0 : i32
    %c0_i32_1 = arith.constant 0 : i32
    return %c0_i32, %c0_i32_0 : i32, i32
  }
  func.func @transform_9(%arg0: i32) -> (i32, i32) {
    %c0_i32 = arith.constant 0 : i32
    %c0_i32_0 = arith.constant 0 : i32
    return %arg0, %c0_i32 : i32, i32
  }
}

</mosaic_0001>

<bundles_post_ra>
// kernel: tpu_custom_call.1
= control target key start
LH: loop header
LB: loop body
LE: loop exit
PB: predicated region body
PF: predicated region fallthrough
CT: control target
= control target key end

     0   :  { %14 = vsyncpa [#allocation4], 0  ;;  %s2170_s0 = inlined_call_operand.hbm [shape: f32[8,8,16], index: 0, kind: input, shape index: {}]   ;;  %s2171_s1 = inlined_call_operand.vmem [shape: s32[8,1], index: 1, kind: input, shape index: {}]   ;;  %s2172_s2 = inlined_call_operand.vmem [shape: bf16[16,128], index: 2, kind: input, shape index: {}]   ;;  %s2173_s3 = inlined_call_operand.vmem [shape: bf16[32,128], index: 3, kind: input, shape index: {}]   ;;  %s2174_s4 = inlined_call_operand.hbm [shape: bf16[64,128], index: 4, kind: input, shape index: {}]   ;;  %s2175_s5 = inlined_call_operand.vmem [shape: f32[1,128], index: 5, kind: input, shape index: {}]   ;;  %s2176_s6 = inlined_call_operand.vmem [shape: f32[1,128], index: 6, kind: input, shape index: {}]   ;;  %s2177_s7 = inlined_call_operand.vmem [shape: bf16[32,8], index: 7, kind: input, shape index: {}]   ;;  %s2178_s8 = inlined_call_operand.vmem [shape: f32[1,8], index: 8, kind: input, shape index: {}]   ;;  %s2179_s9 = inlined_call_operand.hbm [shape: f32[8,8], index: 9, kind: output, shape index: {}]  }
   0x1   :  { %15 = vsyncpa [#allocation7], 0 }
   0x2   :  { %16 = vsyncpa [#allocation5], 0  ;;  %s21_s11 = sshll.u32 %s2170_s0, 4  ;;  %s1613_s12 = smov [#allocation3]   ;;  %s22_s11 = int_to_ptr.hbm [resolvable:$true] %s21_s11 }
   0x3   :  { %s23_s13 = sshll.u32 %s1613_s12, 4  ;;  %s40_s16 = sshll.u32 %s2174_s4, 4  ;;  %s24_s13 = int_to_ptr.vmem [resolvable:$true] %s23_s13  ;;  %s41_s16 = int_to_ptr.hbm [resolvable:$true] %s40_s16 }
   0x4   :  { %s1614_s17 = smov 128   ;;  %s1615_s18 = smov 8  }
   0x5   :  { %29 = dma.hbm_to_vmem [thread:$0]  %s22_s11, 1024, %s24_s13, [#allocation4], %s1614_s17, %s1614_s17, %s1615_s18  }
   0x6   :  { %s1616_s19 = smov [#allocation6]   ;;  %s1617_s21 = smov 64  }
   0x7   :  { %s42_s20 = sshll.u32 %s1616_s19, 4  ;;  %s1618_s22 = smov 4   ;;  %s43_s20 = int_to_ptr.vmem [resolvable:$true] %s42_s20 }
   0x8   :  { %48 = dma.hbm_to_vmem [thread:$0]  %s41_s16, 512, %s43_s20, [#allocation7], %s1617_s21, %s1617_s21, %s1618_s22  }
   0x9   :  { %1607 = dma.done.wait [#allocation4], 1024  }
   0xa   :  { %1608 = vsyncadd [#allocation4], 4294966272 }
   0xb   :  { %1609 = dma.done.wait [#allocation7], 512  }
   0xc   :  { %1610 = vsyncadd [#allocation7], 4294966784  ;;  %v1619_v0 = vmov 0   ;;  %v1380_v1 = vld [vmem:[%s2172_s2] sm:$0xff]  ;;  %v1689_v2 = vld [vmem:[%s2173_s3 + $0x8] sm:$0xff]  ;;  %vm90_vm0 = vcmask 130048  }
   0xd   :  { %1398 = vset.pattern.permute.xlu1 %v1619_v0  ;;  %1399 = vset.pattern.permute.xlu2 %v1619_v0  ;;  %v66_v3 = vld [vmem:[#allocation3] sm:$0xff]  ;;  %v67_v4 = vld [vmem:[#allocation3 + $0x8] sm:$0xff]  ;;  %s1620_s27 = smov 32   ;;  %v1725_v35 = vld [vmem:[#allocation6 + $0x18] sm:$0xff]  ;;  %vm171_vm7 = vcmask 261120   ;;  %vm263_vm8 = vcmask 523264  }
   0xe   :  { %1400 = vset.pattern.permute.xlu0 %v1619_v0  ;;  %110 = vmatpush.bf16.msra.mxu0 %v1380_v1  ;;  %v74_v5 = vpack.c.bf16 %v67_v4, %v66_v3  ;;  %v1695_v6 = vld [vmem:[%s2173_s3] sm:$0xff]  ;;  %v1741_v41 = vld [vmem:[#allocation6 + $0x10] sm:$0xff]  ;;  %v1744_v42 = vld [vmem:[#allocation6 + $0x8] sm:$0xff]  ;;  %s1621_s20 = smov [#allocation8]  }
   0xf   :  { %181 = vmatpush.bf16.msra.mxu1 %v1689_v2  ;;  %335 = vmatpush.bf16.msra.mxu3 %v1689_v2  ;;  %v1709_v7 = vld [vmem:[%s2175_s5] ss:$0 sm:$0xff] }
  0x10   :  { %v1720_v33 = vld [vmem:[%s2171_s1] sm:$0xff]  ;;  %271 = vmatpush.bf16.msra.mxu2 %v1725_v35 }
  0x11   :  { %1312 = vmatmul.msk.bf16.vlgmr.msra.gmra.mxu0 %vm90_vm0, %v74_v5  ;;  %vm157_vm5 = vcmp.gt.s32.totalorder %v1720_v33, 0  ;;  %v1749_v43 = vld [vmem:[#allocation6] sm:$0xff]  ;;  %vm319_vm13 = vcmp.gt.s32.totalorder %v1720_v33, 1 }
  0x12   :  { %1000 = vmatpush.bf16.msrb.mxu0 %v1689_v2  ;;  %v226_v34 = vsel %vm157_vm5, 1, %v1619_v0  ;;  %v1772_v53 = vld [vmem:[%s2176_s6] ss:$0 sm:$0xff] }
  0x13   :  { %182 = vmatpush.bf16.msra.mxu1 %v1695_v6  ;;  %336 = vmatpush.bf16.msra.mxu3 %v1695_v6 }
  0x14   :  { %272 = vmatpush.bf16.msra.mxu2 %v1741_v41 }
  0x16   :  { %1001 = vmatpush.bf16.msrb.mxu0 %v1695_v6  ;;  %183 = vmatmul.bf16.vlgmr.msra.gmra.mxu1 %v1619_v0 }
  0x17   :  { %468 = vmatpush.bf16.msrb.mxu3 %v1689_v2  ;;  %404 = vmatpush.bf16.msrb.mxu1 %v1725_v35 }
  0x18   :  { %273 = vmatpush.bf16.msra.mxu2 %v1744_v42 }
  0x1b   :  { %469 = vmatpush.bf16.msrb.mxu3 %v1695_v6  ;;  %405 = vmatpush.bf16.msrb.mxu1 %v1741_v41 }
  0x1c   :  { %274 = vmatpush.bf16.msra.mxu2 %v1749_v43 }
  0x1f   :  { %406 = vmatpush.bf16.msrb.mxu1 %v1744_v42 }
  0x20   :  { %537 = vmatpush.bf16.msrb.mxu2 %v1725_v35 }
  0x23   :  { %407 = vmatpush.bf16.msrb.mxu1 %v1749_v43 }
  0x24   :  { %538 = vmatpush.bf16.msrb.mxu2 %v1741_v41 }
  0x27   :  { %601 = vmatpush.bf16.msra.mxu1 %v1689_v2 }
  0x28   :  { %539 = vmatpush.bf16.msrb.mxu2 %v1744_v42 }
  0x2b   :  { %602 = vmatpush.bf16.msra.mxu1 %v1695_v6 }
  0x2c   :  { %540 = vmatpush.bf16.msrb.mxu2 %v1749_v43 }
  0x8e   :  { %v112_v8 = vpop.f32.mrf.mxu0 }
  0x8f   :  { %v113_v9 = vadd.f32 %v1709_v7, %v112_v8 }
  0x93   :  { %v184_v10 = vpop.f32.mrf.mxu1 }
  0x94   :  { %v188_v11 = vadd.f32 %v184_v10, %v113_v9 }
  0x96   :  { %1404 = vtanh.f32 %v188_v11  ;;  %v1324_v14 = vmul.f32 -1.442695, %v188_v11  ;;  %v114_v48 = vpop.f32.mrf.mxu0 }
  0x97   :  { %v115_v49 = vadd.f32 %v1709_v7, %v114_v48 }
  0x98   :  { %1406 = vpow2.f32 %v1324_v14 }
  0x9b   :  { %v186_v12 = vpop.f32.mrf.mxu1 }
  0x9c   :  { %v1405_v13 = vpop.eup %1404 }
  0x9d   :  { %211 = vrot.lane.b32.xlu0 %v1405_v13, %s1617_s21 }
  0x9e   :  { %v1407_v15 = vpop.eup %1406 }
  0x9f   :  { %v192_v16 = vadd.f32 1.0, %v1407_v15 }
  0xa1   :  { %1408 = vrcp.f32 %v192_v16  ;;  %v204_v22 = vand.u32 2147483648, %v192_v16  ;;  %vm198_vm2 = vweird.f32 %v192_v16  ;;  %v202_v23 = vand.u32 2147483647, %v192_v16 }
  0xa3   :  { %v205_v25 = vor.u32 1.1754944e-38, %v204_v22  ;;  %vm203_vm4 = vcmp.eq.f32.partialorder %v202_v23, 8.507059e+37 }
  0xa7   :  { %v1409_v17 = vpop.eup %1408 }
  0xa8   :  { %v194_v18 = vmul.f32 %v1409_v17, %v192_v16  ;;  %vm199_vm1 = vweird.f32 %v1409_v17 }
  0xa9   :  { %vm200_vm3 = vmor %vm198_vm2, %vm199_vm1 }
  0xaa   :  { %v195_v19 = vsub.f32 1.0, %v194_v18 }
  0xac   :  { %v196_v20 = vmul.f32 %v1409_v17, %v195_v19 }
  0xae   :  { %v197_v21 = vadd.f32 %v1409_v17, %v196_v20 }
  0xb0   :  { %v201_v24 = vsel %vm200_vm3, %v1409_v17, %v197_v21 }
  0xb1   :  { %v206_v27 = vsel %vm203_vm4, %v205_v25, %v201_v24  ;;  %v380_v24 = vsel %vm319_vm13, 1, %v1619_v0 }
  0xb2   :  { %v209_v29 = vmul.f32 0.0, %v206_v27 }
 0x10f   :  { %v212_v26 = vpop.permute.xlu0 %211 }
 0x110   :  { %v214_v28 = vmul.f32 %v212_v26, %v206_v27 }
 0x112   :  { %216 = vrot.lane.b32.xlu0 %v214_v28, %s1620_s27 }
 0x184   :  { %v217_v30 = vpop.permute.xlu0 %216 }
 0x185   :  { %v1714_v31 = vadd.f32 %v217_v30, %v209_v29 }
 0x187   :  { %1410 = vtanh.f32 %v1714_v31 }
 0x18d   :  { %v1411_v32 = vpop.eup %1410 }
 0x18e   :  { %222 = vrot.lane.b32.xlu1 %v1411_v32, %s1617_s21 }
 0x196   :  { %228 = vperm.xlu1 %1398, %v226_v34  }
 0x200   :  { %v223_v36 = vpop.permute.xlu1 %222 }
 0x201   :  { %v225_v37 = vmul.f32 %v223_v36, %v206_v27 }
 0x208   :  { %v1729_v38 = vpop.permute.xlu1 %228 }
 0x209   :  { %vm230_vm6 = vcmp.eq.s32.totalorder %v1729_v38, 1 }
 0x20a   :  { %v1734_v39 = vsel %vm230_vm6, %v225_v37, 0.0  ;;  %v1784_v30 = vsel %vm230_vm6, %v1714_v31, 0.0 }
 0x20b   :  { %v322_v40 = vpack.c.bf16 %v1734_v39, %v1734_v39 }
 0x20d   :  { %324 = vrot.lane.b32.xlu2 %v322_v40, %s1620_s27 }
 0x215   :  { %234 = vrot.lane.b32.xlu2 %v1734_v39, %s1620_s27 }
 0x267   :  { %v325_v44 = vpop.permute.xlu2 %324 }
 0x268   :  { %1343 = vmatmul.msk.bf16.vlgmr.msra.gmra.mxu3 %vm171_vm7, %v325_v44 }
 0x269   :  { %670 = vmatpush.bf16.msra.mxu3 %v1725_v35 }
 0x26d   :  { %671 = vmatpush.bf16.msra.mxu3 %v1741_v41 }
 0x26f   :  { %v235_v45 = vpop.permute.xlu2 %234 }
 0x270   :  { %v237_v46 = vsel %vm171_vm7, %v235_v45, 0.0 }
 0x271   :  { %v238_v47 = vpack.c.bf16 %v237_v46, %v237_v46  ;;  %672 = vmatpush.bf16.msra.mxu3 %v1744_v42 }
 0x273   :  { %1341 = vmatmul.msk.bf16.vlgmr.msra.gmra.mxu2 %vm263_vm8, %v238_v47 }
 0x274   :  { %734 = vmatpush.bf16.msra.mxu2 %v1689_v2 }
 0x275   :  { %673 = vmatpush.bf16.msra.mxu3 %v1749_v43 }
 0x278   :  { %735 = vmatpush.bf16.msra.mxu2 %v1695_v6 }
 0x2eb   :  { %v338_v50 = vpop.f32.mrf.mxu3 }
 0x2ec   :  { %v342_v51 = vadd.f32 %v338_v50, %v115_v49 }
 0x2ee   :  { %1412 = vtanh.f32 %v342_v51  ;;  %v1344_v59 = vmul.f32 -1.442695, %v342_v51 }
 0x2f3   :  { %v340_v52 = vpop.f32.mrf.mxu3 }
 0x2f4   :  { %v1413_v54 = vpop.eup %1412 }
 0x2f5   :  { %365 = vrot.lane.b32.xlu0 %v1413_v54, %s1617_s21 }
 0x2f6   :  { %v276_v55 = vpop.f32.mrf.mxu2 }
 0x2f7   :  { %v277_v56 = vadd.f32 %v1772_v53, %v276_v55  ;;  %v68_v55 = vld [vmem:[#allocation3 + $0x10] sm:$0xff] }
 0x2f9   :  { %1414 = vtanh.f32 %v277_v56  ;;  %v1342_v61 = vmul.f32 -1.442695, %v277_v56 }
 0x2fa   :  { %1416 = vpow2.f32 %v1344_v59 }
 0x2fb   :  { %1418 = vpow2.f32 %v1342_v61 }
 0x2fe   :  { %v278_v57 = vpop.f32.mrf.mxu2 }
 0x2ff   :  { %v1415_v58 = vpop.eup %1414 }
 0x300   :  { %302 = vrot.lane.b32.xlu1 %v1415_v58, %s1617_s21  ;;  %v1417_v60 = vpop.eup %1416 }
 0x301   :  { %v346_v62 = vadd.f32 1.0, %v1417_v60  ;;  %v1419_v63 = vpop.eup %1418 }
 0x302   :  { %v283_v3 = vadd.f32 1.0, %v1419_v63 }
 0x303   :  { %1420 = vrcp.f32 %v346_v62  ;;  %v358_v12 = vand.u32 2147483648, %v346_v62  ;;  %vm352_vm10 = vweird.f32 %v346_v62  ;;  %v356_v13 = vand.u32 2147483647, %v346_v62 }
 0x304   :  { %1422 = vrcp.f32 %v283_v3  ;;  %v295_v22 = vand.u32 2147483648, %v283_v3  ;;  %vm289_vm15 = vweird.f32 %v283_v3  ;;  %v293_v23 = vand.u32 2147483647, %v283_v3 }
 0x305   :  { %v359_v16 = vor.u32 1.1754944e-38, %v358_v12  ;;  %vm357_vm12 = vcmp.eq.f32.partialorder %v356_v13, 8.507059e+37 }
 0x306   :  { %v296_v26 = vor.u32 1.1754944e-38, %v295_v22  ;;  %vm294_vm2 = vcmp.eq.f32.partialorder %v293_v23, 8.507059e+37 }
 0x309   :  { %v1421_v1 = vpop.eup %1420 }
 0x30a   :  { %v348_v4 = vmul.f32 %v1421_v1, %v346_v62  ;;  %v1423_v9 = vpop.eup %1422  ;;  %vm353_vm9 = vweird.f32 %v1421_v1 }
 0x30b   :  { %v285_v11 = vmul.f32 %v1423_v9, %v283_v3  ;;  %vm354_vm11 = vmor %vm352_vm10, %vm353_vm9  ;;  %vm290_vm14 = vweird.f32 %v1423_v9 }
 0x30c   :  { %v349_v5 = vsub.f32 1.0, %v348_v4  ;;  %vm291_vm1 = vmor %vm289_vm15, %vm290_vm14 }
 0x30d   :  { %v286_v15 = vsub.f32 1.0, %v285_v11 }
 0x30e   :  { %v350_v8 = vmul.f32 %v1421_v1, %v349_v5 }
 0x30f   :  { %v287_v20 = vmul.f32 %v1423_v9, %v286_v15 }
 0x310   :  { %v351_v10 = vadd.f32 %v1421_v1, %v350_v8 }
 0x311   :  { %v288_v21 = vadd.f32 %v1423_v9, %v287_v20 }
 0x312   :  { %v355_v14 = vsel %vm354_vm11, %v1421_v1, %v351_v10  ;;  %vm452_vm11 = vcmp.gt.s32.totalorder %v1720_v33, 2 }
 0x313   :  { %v360_v18 = vsel %vm357_vm12, %v359_v16, %v355_v14  ;;  %v292_v25 = vsel %vm291_vm1, %v1423_v9, %v288_v21 }
 0x314   :  { %v297_v28 = vsel %vm294_vm2, %v296_v26, %v292_v25  ;;  %v363_v32 = vmul.f32 %v360_v18, %v1784_v30 }
 0x315   :  { %v300_v40 = vmul.f32 0.0, %v297_v28 }
 0x367   :  { %v366_v17 = vpop.permute.xlu0 %365 }
 0x368   :  { %v368_v19 = vmul.f32 %v366_v17, %v360_v18 }
 0x36a   :  { %370 = vrot.lane.b32.xlu2 %v368_v19, %s1620_s27 }
 0x372   :  { %382 = vperm.xlu2 %1399, %v380_v24   ;;  %v303_v27 = vpop.permute.xlu1 %302 }
 0x373   :  { %v305_v29 = vmul.f32 %v303_v27, %v297_v28  ;;  %v513_v27 = vsel %vm452_vm11, 1, %v1619_v0 }
 0x375   :  { %307 = vrot.lane.b32.xlu0 %v305_v29, %s1620_s27 }
 0x3c4   :  { %v371_v34 = vpop.permute.xlu2 %370 }
 0x3c5   :  { %v1787_v36 = vadd.f32 %v371_v34, %v363_v32 }
 0x3c7   :  { %1424 = vtanh.f32 %v1787_v36 }
 0x3cc   :  { %v1795_v31 = vpop.permute.xlu2 %382 }
 0x3cd   :  { %v1425_v37 = vpop.eup %1424  ;;  %vm384_vm3 = vcmp.eq.s32.totalorder %v1795_v31, 1 }
 0x3ce   :  { %376 = vrot.lane.b32.xlu1 %v1425_v37, %s1617_s21 }
 0x3e7   :  { %v308_v44 = vpop.permute.xlu0 %307 }
 0x3e8   :  { %v1791_v45 = vadd.f32 %v308_v44, %v300_v40 }
 0x3ea   :  { %1426 = vtanh.f32 %v1791_v45 }
 0x3f0   :  { %v1427_v46 = vpop.eup %1426 }
 0x3f1   :  { %313 = vrot.lane.b32.xlu0 %v1427_v46, %s1617_s21 }
 0x440   :  { %v377_v47 = vpop.permute.xlu1 %376 }
 0x441   :  { %v379_v48 = vmul.f32 %v377_v47, %v360_v18 }
 0x443   :  { %v1801_v49 = vsel %vm384_vm3, %v379_v48, %v1734_v39  ;;  %v69_v39 = vld [vmem:[#allocation3 + $0x18] sm:$0xff] }
 0x444   :  { %388 = vrot.lane.b32.xlu2 %v1801_v49, %s1620_s27  ;;  %v455_v50 = vpack.c.bf16 %v1801_v49, %v1801_v49  ;;  %v75_v56 = vpack.c.bf16 %v69_v39, %v68_v55 }
 0x446   :  { %457 = vrot.lane.b32.xlu1 %v455_v50, %s1620_s27  ;;  %1313 = vmatmul.msk.bf16.gmra.mxu0 %vm90_vm0, %v75_v56  ;;  %v1836_v56 = vsel %vm384_vm3, %v1787_v36, %v1784_v30 }
 0x463   :  { %v314_v51 = vpop.permute.xlu0 %313 }
 0x464   :  { %v316_v52 = vmul.f32 %v314_v51, %v297_v28 }
 0x466   :  { %v1810_v54 = vsel %vm230_vm6, %v316_v52, 0.0 }
 0x467   :  { %392 = vrot.lane.b32.xlu0 %v1810_v54, %s1617_s21 }
 0x49e   :  { %v389_v58 = vpop.permute.xlu2 %388 }
 0x4b8   :  { %v458_v57 = vpop.permute.xlu1 %457 }
 0x4b9   :  { %1347 = vmatmul.msk.bf16.vlgmr.msrb.gmra.mxu3 %vm171_vm7, %v458_v57 }
 0x4ba   :  { %867 = vmatpush.bf16.msrb.mxu3 %v1689_v2 }
 0x4be   :  { %868 = vmatpush.bf16.msrb.mxu3 %v1695_v6 }
 0x4c3   :  { %v117_v62 = vpop.f32.mrf.mxu0 }
 0x4c4   :  { %v118_v63 = vadd.f32 %v1709_v7, %v117_v62 }
 0x4d9   :  { %v393_v59 = vpop.permute.xlu0 %392 }
 0x4da   :  { %v395_v60 = vsel %vm171_vm7, %v389_v58, %v393_v59 }
 0x4db   :  { %v396_v61 = vpack.c.bf16 %v395_v60, %v395_v60 }
 0x4dd   :  { %1345 = vmatmul.msk.bf16.vlgmr.msrb.gmra.mxu1 %vm263_vm8, %v396_v61  ;;  %v1846_v61 = vsel %vm230_vm6, %v1791_v45, 0.0 }
 0x4de   :  { %803 = vmatpush.bf16.msrb.mxu1 %v1725_v35 }
 0x4e2   :  { %804 = vmatpush.bf16.msrb.mxu1 %v1741_v41 }
 0x4e6   :  { %805 = vmatpush.bf16.msrb.mxu1 %v1744_v42 }
 0x4ea   :  { %806 = vmatpush.bf16.msrb.mxu1 %v1749_v43 }
 0x53c   :  { %v471_v1 = vpop.f32.mrf.mxu3 }
 0x53d   :  { %v475_v3 = vadd.f32 %v471_v1, %v118_v63 }
 0x53f   :  { %1428 = vtanh.f32 %v475_v3  ;;  %v1348_v12 = vmul.f32 -1.442695, %v475_v3 }
 0x544   :  { %v473_v4 = vpop.f32.mrf.mxu3 }
 0x545   :  { %v1429_v5 = vpop.eup %1428 }
 0x546   :  { %498 = vrot.lane.b32.xlu2 %v1429_v5, %s1617_s21 }
 0x55a   :  { %v409_v8 = vpop.f32.mrf.mxu1 }
 0x55b   :  { %v410_v9 = vadd.f32 %v1772_v53, %v409_v8 }
 0x55d   :  { %1430 = vtanh.f32 %v410_v9  ;;  %v1346_v28 = vmul.f32 -1.442695, %v410_v9 }
 0x55e   :  { %1432 = vpow2.f32 %v1348_v12 }
 0x562   :  { %v411_v10 = vpop.f32.mrf.mxu1 }
 0x563   :  { %v1431_v11 = vpop.eup %1430 }
 0x564   :  { %435 = vrot.lane.b32.xlu1 %v1431_v11, %s1617_s21  ;;  %v1433_v13 = vpop.eup %1432 }
 0x565   :  { %v479_v14 = vadd.f32 1.0, %v1433_v13  ;;  %v119_v13 = vpop.f32.mrf.mxu0 }
 0x567   :  { %1434 = vrcp.f32 %v479_v14  ;;  %v491_v20 = vand.u32 2147483648, %v479_v14  ;;  %vm485_vm5 = vweird.f32 %v479_v14  ;;  %v489_v21 = vand.u32 2147483647, %v479_v14 }
 0x568   :  { %1436 = vpow2.f32 %v1346_v28 }
 0x569   :  { %v492_v23 = vor.u32 1.1754944e-38, %v491_v20  ;;  %vm490_vm10 = vcmp.eq.f32.partialorder %v489_v21, 8.507059e+37 }
 0x56d   :  { %v1435_v15 = vpop.eup %1434 }
 0x56e   :  { %v481_v16 = vmul.f32 %v1435_v15, %v479_v14  ;;  %vm486_vm4 = vweird.f32 %v1435_v15  ;;  %v1437_v29 = vpop.eup %1436  ;;  %v120_v14 = vadd.f32 %v1709_v7, %v119_v13 }
 0x56f   :  { %vm487_vm9 = vmor %vm485_vm5, %vm486_vm4  ;;  %v416_v32 = vadd.f32 1.0, %v1437_v29 }
 0x570   :  { %v482_v17 = vsub.f32 1.0, %v481_v16 }
 0x571   :  { %1438 = vrcp.f32 %v416_v32  ;;  %v428_v47 = vand.u32 2147483648, %v416_v32  ;;  %vm422_vm13 = vweird.f32 %v416_v32  ;;  %v426_v48 = vand.u32 2147483647, %v416_v32 }
 0x572   :  { %v483_v18 = vmul.f32 %v1435_v15, %v482_v17 }
 0x573   :  { %v429_v51 = vor.u32 1.1754944e-38, %v428_v47  ;;  %vm427_vm15 = vcmp.eq.f32.partialorder %v426_v48, 8.507059e+37 }
 0x574   :  { %v484_v19 = vadd.f32 %v1435_v15, %v483_v18 }
 0x576   :  { %v488_v22 = vsel %vm487_vm9, %v1435_v15, %v484_v19  ;;  %vm585_vm9 = vcmp.gt.s32.totalorder %v1720_v33, 3 }
 0x577   :  { %v493_v25 = vsel %vm490_vm10, %v492_v23, %v488_v22  ;;  %v1439_v34 = vpop.eup %1438 }
 0x578   :  { %v418_v37 = vmul.f32 %v1439_v34, %v416_v32  ;;  %vm423_vm12 = vweird.f32 %v1439_v34  ;;  %v496_v57 = vmul.f32 %v493_v25, %v1836_v56 }
 0x579   :  { %vm424_vm14 = vmor %vm422_vm13, %vm423_vm12 }
 0x57a   :  { %v419_v40 = vsub.f32 1.0, %v418_v37 }
 0x57c   :  { %v420_v44 = vmul.f32 %v1439_v34, %v419_v40 }
 0x57e   :  { %v421_v46 = vadd.f32 %v1439_v34, %v420_v44 }
 0x580   :  { %v425_v50 = vsel %vm424_vm14, %v1439_v34, %v421_v46 }
 0x581   :  { %v430_v52 = vsel %vm427_vm15, %v429_v51, %v425_v50  ;;  %v646_v50 = vsel %vm585_vm9, 1, %v1619_v0 }
 0x582   :  { %v433_v62 = vmul.f32 %v430_v52, %v1846_v61 }
 0x5a0   :  { %v499_v24 = vpop.permute.xlu2 %498 }
 0x5a1   :  { %v501_v26 = vmul.f32 %v499_v24, %v493_v25 }
 0x5a3   :  { %503 = vrot.lane.b32.xlu1 %v501_v26, %s1620_s27 }
 0x5ab   :  { %515 = vperm.xlu1 %1398, %v513_v27  }
 0x5d6   :  { %v436_v55 = vpop.permute.xlu1 %435 }
 0x5d7   :  { %v438_v39 = vmul.f32 %v436_v55, %v430_v52 }
 0x5d9   :  { %440 = vrot.lane.b32.xlu0 %v438_v39, %s1620_s27 }
 0x615   :  { %v504_v58 = vpop.permute.xlu1 %503 }
 0x616   :  { %v1839_v59 = vadd.f32 %v504_v58, %v496_v57 }
 0x618   :  { %1440 = vtanh.f32 %v1839_v59 }
 0x61d   :  { %v1853_v1 = vpop.permute.xlu1 %515 }
 0x61e   :  { %v1441_v60 = vpop.eup %1440  ;;  %vm517_vm1 = vcmp.eq.s32.totalorder %v1853_v1, 1 }
 0x61f   :  { %509 = vrot.lane.b32.xlu0 %v1441_v60, %s1617_s21 }
 0x64b   :  { %v441_v63 = vpop.permute.xlu0 %440 }
 0x64c   :  { %v1849_v30 = vadd.f32 %v441_v63, %v433_v62 }
 0x64e   :  { %1442 = vtanh.f32 %v1849_v30  ;;  %v1907_v13 = vsel %vm384_vm3, %v1849_v30, %v1846_v61 }
 0x654   :  { %v1443_v36 = vpop.eup %1442 }
 0x655   :  { %446 = vrot.lane.b32.xlu2 %v1443_v36, %s1617_s21 }
 0x691   :  { %v510_v3 = vpop.permute.xlu0 %509 }
 0x692   :  { %v512_v4 = vmul.f32 %v510_v3, %v493_v25 }
 0x694   :  { %v1859_v38 = vsel %vm517_vm1, %v512_v4, %v1801_v49 }
 0x695   :  { %521 = vrot.lane.b32.xlu2 %v1859_v38, %s1620_s27  ;;  %v588_v45 = vpack.c.bf16 %v1859_v38, %v1859_v38 }
 0x697   :  { %590 = vrot.lane.b32.xlu1 %v588_v45, %s1620_s27 }
 0x6af   :  { %v447_v5 = vpop.permute.xlu2 %446 }
 0x6b0   :  { %v449_v8 = vmul.f32 %v447_v5, %v430_v52 }
 0x6b2   :  { %v1869_v9 = vsel %vm384_vm3, %v449_v8, %v1810_v54 }
 0x6b3   :  { %525 = vrot.lane.b32.xlu0 %v1869_v9, %s1617_s21 }
 0x6ef   :  { %v522_v10 = vpop.permute.xlu2 %521 }
 0x709   :  { %v591_v49 = vpop.permute.xlu1 %590 }
 0x70a   :  { %1351 = vmatmul.msk.bf16.vlgmr.msra.gmra.mxu1 %vm171_vm7, %v591_v49  ;;  %v1896_v49 = vsel %vm517_vm1, %v1839_v59, %v1836_v56 }
 0x70b   :  { %1069 = vmatpush.bf16.msra.mxu1 %v1725_v35 }
 0x70f   :  { %1070 = vmatpush.bf16.msra.mxu1 %v1741_v41 }
 0x713   :  { %1071 = vmatpush.bf16.msra.mxu1 %v1744_v42 }
 0x717   :  { %1072 = vmatpush.bf16.msra.mxu1 %v1749_v43 }
 0x725   :  { %v526_v11 = vpop.permute.xlu0 %525 }
 0x726   :  { %v528_v12 = vsel %vm171_vm7, %v522_v10, %v526_v11 }
 0x727   :  { %v529_v54 = vpack.c.bf16 %v528_v12, %v528_v12 }
 0x729   :  { %1349 = vmatmul.msk.bf16.vlgmr.msrb.gmra.mxu2 %vm263_vm8, %v529_v54 }
 0x72a   :  { %936 = vmatpush.bf16.msrb.mxu2 %v1725_v35 }
 0x72e   :  { %937 = vmatpush.bf16.msrb.mxu2 %v1741_v41 }
 0x732   :  { %938 = vmatpush.bf16.msrb.mxu2 %v1744_v42 }
 0x736   :  { %939 = vmatpush.bf16.msrb.mxu2 %v1749_v43 }
 0x787   :  { %v604_v15 = vpop.f32.mrf.mxu1 }
 0x788   :  { %v608_v16 = vadd.f32 %v604_v15, %v120_v14 }
 0x78a   :  { %1444 = vtanh.f32 %v608_v16  ;;  %v1352_v23 = vmul.f32 -1.442695, %v608_v16 }
 0x78f   :  { %v606_v17 = vpop.f32.mrf.mxu1 }
 0x790   :  { %v1445_v18 = vpop.eup %1444 }
 0x791   :  { %631 = vrot.lane.b32.xlu2 %v1445_v18, %s1617_s21 }
 0x7ac   :  { %v542_v19 = vpop.f32.mrf.mxu2 }
 0x7ad   :  { %v543_v20 = vadd.f32 %v1772_v53, %v542_v19 }
 0x7af   :  { %1446 = vtanh.f32 %v543_v20  ;;  %v1350_v51 = vmul.f32 -1.442695, %v543_v20 }
 0x7b0   :  { %1448 = vpow2.f32 %v1352_v23 }
 0x7b4   :  { %v544_v21 = vpop.f32.mrf.mxu2 }
 0x7b5   :  { %v1447_v22 = vpop.eup %1446  ;;  %v71_v21 = vld [vmem:[#allocation3 + $0x28] sm:$0xff] }
 0x7b6   :  { %568 = vrot.lane.b32.xlu0 %v1447_v22, %s1617_s21  ;;  %v1449_v24 = vpop.eup %1448 }
 0x7b7   :  { %v612_v25 = vadd.f32 1.0, %v1449_v24 }
 0x7b9   :  { %1450 = vrcp.f32 %v612_v25  ;;  %v624_v34 = vand.u32 2147483648, %v612_v25  ;;  %vm618_vm2 = vweird.f32 %v612_v25  ;;  %v622_v37 = vand.u32 2147483647, %v612_v25 }
 0x7ba   :  { %1452 = vpow2.f32 %v1350_v51 }
 0x7bb   :  { %v625_v44 = vor.u32 1.1754944e-38, %v624_v34  ;;  %vm623_vm5 = vcmp.eq.f32.partialorder %v622_v37, 8.507059e+37 }
 0x7bf   :  { %v1451_v26 = vpop.eup %1450 }
 0x7c0   :  { %v614_v27 = vmul.f32 %v1451_v26, %v612_v25  ;;  %vm619_vm6 = vweird.f32 %v1451_v26  ;;  %v1453_v52 = vpop.eup %1452 }
 0x7c1   :  { %vm620_vm4 = vmor %vm618_vm2, %vm619_vm6  ;;  %v549_v55 = vadd.f32 1.0, %v1453_v52 }
 0x7c2   :  { %v615_v28 = vsub.f32 1.0, %v614_v27 }
 0x7c3   :  { %1454 = vrcp.f32 %v549_v55  ;;  %v561_v63 = vand.u32 2147483648, %v549_v55  ;;  %vm555_vm11 = vweird.f32 %v549_v55  ;;  %v559_v36 = vand.u32 2147483647, %v549_v55 }
 0x7c4   :  { %v616_v29 = vmul.f32 %v1451_v26, %v615_v28 }
 0x7c5   :  { %v562_v4 = vor.u32 1.1754944e-38, %v561_v63  ;;  %vm560_vm13 = vcmp.eq.f32.partialorder %v559_v36, 8.507059e+37 }
 0x7c6   :  { %v617_v32 = vadd.f32 %v1451_v26, %v616_v29 }
 0x7c8   :  { %v621_v40 = vsel %vm620_vm4, %v1451_v26, %v617_v32 }
 0x7c9   :  { %v626_v47 = vsel %vm623_vm5, %v625_v44, %v621_v40  ;;  %v1455_v39 = vpop.eup %1454 }
 0x7ca   :  { %v551_v57 = vmul.f32 %v1455_v39, %v549_v55  ;;  %vm556_vm10 = vweird.f32 %v1455_v39  ;;  %v629_v10 = vmul.f32 %v626_v47, %v1896_v49 }
 0x7cb   :  { %vm557_vm12 = vmor %vm555_vm11, %vm556_vm10  ;;  %vm718_vm11 = vcmp.gt.s32.totalorder %v1720_v33, 4 }
 0x7cc   :  { %v552_v58 = vsub.f32 1.0, %v551_v57 }
 0x7ce   :  { %v553_v60 = vmul.f32 %v1455_v39, %v552_v58 }
 0x7d0   :  { %v554_v62 = vadd.f32 %v1455_v39, %v553_v60 }
 0x7d2   :  { %v558_v3 = vsel %vm557_vm12, %v1455_v39, %v554_v62 }
 0x7d3   :  { %v563_v5 = vsel %vm560_vm13, %v562_v4, %v558_v3 }
 0x7d4   :  { %v566_v14 = vmul.f32 %v563_v5, %v1907_v13 }
 0x7eb   :  { %v632_v46 = vpop.permute.xlu2 %631 }
 0x7ec   :  { %v634_v48 = vmul.f32 %v632_v46, %v626_v47 }
 0x7ee   :  { %636 = vrot.lane.b32.xlu1 %v634_v48, %s1620_s27 }
 0x7f6   :  { %648 = vperm.xlu1 %1398, %v646_v50  }
 0x828   :  { %v569_v45 = vpop.permute.xlu0 %568 }
 0x829   :  { %v571_v8 = vmul.f32 %v569_v45, %v563_v5 }
 0x82b   :  { %573 = vrot.lane.b32.xlu2 %v571_v8, %s1620_s27 }
 0x860   :  { %v637_v11 = vpop.permute.xlu1 %636 }
 0x861   :  { %v1899_v12 = vadd.f32 %v637_v11, %v629_v10 }
 0x863   :  { %1456 = vtanh.f32 %v1899_v12 }
 0x868   :  { %v1914_v16 = vpop.permute.xlu1 %648 }
 0x869   :  { %v1457_v54 = vpop.eup %1456  ;;  %vm650_vm14 = vcmp.eq.s32.totalorder %v1914_v16, 1 }
 0x86a   :  { %642 = vrot.lane.b32.xlu0 %v1457_v54, %s1617_s21 }
 0x885   :  { %v574_v56 = vpop.permute.xlu2 %573 }
 0x886   :  { %v1910_v59 = vadd.f32 %v574_v56, %v566_v14 }
 0x888   :  { %1458 = vtanh.f32 %v1910_v59 }
 0x88e   :  { %v1459_v15 = vpop.eup %1458 }
 0x88f   :  { %579 = vrot.lane.b32.xlu2 %v1459_v15, %s1617_s21 }
 0x8dc   :  { %v643_v17 = vpop.permute.xlu0 %642 }
 0x8dd   :  { %v645_v18 = vmul.f32 %v643_v17, %v626_v47 }
 0x8df   :  { %v1920_v31 = vsel %vm650_vm14, %v645_v18, %v1859_v38  ;;  %v70_v38 = vld [vmem:[#allocation3 + $0x20] sm:$0xff]  ;;  %v779_v18 = vsel %vm718_vm11, 1, %v1619_v0 }
 0x8e0   :  { %654 = vrot.lane.b32.xlu1 %v1920_v31, %s1620_s27  ;;  %v721_v61 = vpack.c.bf16 %v1920_v31, %v1920_v31  ;;  %v76_v22 = vpack.c.bf16 %v71_v21, %v70_v38 }
 0x8e2   :  { %723 = vrot.lane.b32.xlu0 %v721_v61, %s1620_s27  ;;  %1314 = vmatmul.msk.bf16.gmra.mxu0 %vm90_vm0, %v76_v22  ;;  %v1956_v61 = vsel %vm650_vm14, %v1899_v12, %v1896_v49  ;;  %v1967_v22 = vsel %vm517_vm1, %v1910_v59, %v1907_v13 }
 0x8e9   :  { %v580_v30 = vpop.permute.xlu2 %579 }
 0x8ea   :  { %v582_v19 = vmul.f32 %v580_v30, %v563_v5 }
 0x8ec   :  { %v1930_v20 = vsel %vm517_vm1, %v582_v19, %v1869_v9 }
 0x8ed   :  { %658 = vrot.lane.b32.xlu2 %v1930_v20, %s1617_s21 }
 0x947   :  { %v659_v23 = vpop.permute.xlu2 %658 }
 0x952   :  { %v655_v24 = vpop.permute.xlu1 %654 }
 0x953   :  { %v661_v25 = vsel %vm171_vm7, %v655_v24, %v659_v23 }
 0x954   :  { %v662_v26 = vpack.c.bf16 %v661_v25, %v661_v25  ;;  %v724_v27 = vpop.permute.xlu0 %723 }
 0x955   :  { %1355 = vmatmul.msk.bf16.vlgmr.msra.gmra.mxu2 %vm171_vm7, %v724_v27 }
 0x956   :  { %1353 = vmatmul.msk.bf16.vlgmr.msra.gmra.mxu3 %vm263_vm8, %v662_v26  ;;  %1201 = vmatpush.bf16.msra.mxu2 %v1725_v35 }
 0x957   :  { %1133 = vmatpush.bf16.msra.mxu3 %v1689_v2 }
 0x95a   :  { %1202 = vmatpush.bf16.msra.mxu2 %v1741_v41 }
 0x95b   :  { %1134 = vmatpush.bf16.msra.mxu3 %v1695_v6 }
 0x95e   :  { %1203 = vmatpush.bf16.msra.mxu2 %v1744_v42 }
 0x95f   :  { %v122_v9 = vpop.f32.mrf.mxu0 }
 0x960   :  { %v123_v28 = vadd.f32 %v1709_v7, %v122_v9 }
 0x962   :  { %1204 = vmatpush.bf16.msra.mxu2 %v1749_v43 }
 0x9d8   :  { %v737_v29 = vpop.f32.mrf.mxu2 }
 0x9d9   :  { %v741_v32 = vadd.f32 %v737_v29, %v123_v28  ;;  %v675_v34 = vpop.f32.mrf.mxu3 }
 0x9da   :  { %v676_v37 = vadd.f32 %v1772_v53, %v675_v34 }
 0x9db   :  { %1460 = vtanh.f32 %v741_v32  ;;  %v1356_v6 = vmul.f32 -1.442695, %v741_v32 }
 0x9dc   :  { %1462 = vtanh.f32 %v676_v37  ;;  %v1354_v42 = vmul.f32 -1.442695, %v676_v37 }
 0x9dd   :  { %1464 = vpow2.f32 %v1356_v6 }
 0x9de   :  { %1466 = vpow2.f32 %v1354_v42 }
 0x9e0   :  { %v739_v35 = vpop.f32.mrf.mxu2 }
 0x9e1   :  { %v1461_v2 = vpop.eup %1460  ;;  %v677_v40 = vpop.f32.mrf.mxu3 }
 0x9e2   :  { %v1463_v41 = vpop.eup %1462  ;;  %764 = vrot.lane.b32.xlu0 %v1461_v2, %s1617_s21  ;;  %v124_v35 = vpop.f32.mrf.mxu0 }
 0x9e3   :  { %701 = vrot.lane.b32.xlu1 %v1463_v41, %s1617_s21  ;;  %v1465_v43 = vpop.eup %1464  ;;  %v125_v2 = vadd.f32 %v1709_v7, %v124_v35  ;;  %v73_v35 = vld [vmem:[#allocation3 + $0x38] sm:$0xff] }
 0x9e4   :  { %v1467_v44 = vpop.eup %1466  ;;  %v745_v46 = vadd.f32 1.0, %v1465_v43 }
 0x9e5   :  { %v682_v47 = vadd.f32 1.0, %v1467_v44 }
 0x9e6   :  { %1468 = vrcp.f32 %v745_v46  ;;  %v757_v62 = vand.u32 2147483648, %v745_v46  ;;  %vm751_vm6 = vweird.f32 %v745_v46  ;;  %v755_v36 = vand.u32 2147483647, %v745_v46 }
 0x9e7   :  { %1470 = vrcp.f32 %v682_v47  ;;  %v694_v3 = vand.u32 2147483648, %v682_v47  ;;  %vm688_vm4 = vweird.f32 %v682_v47  ;;  %v692_v4 = vand.u32 2147483647, %v682_v47 }
 0x9e8   :  { %v758_v5 = vor.u32 1.1754944e-38, %v757_v62  ;;  %vm756_vm9 = vcmp.eq.f32.partialorder %v755_v36, 8.507059e+37 }
 0x9e9   :  { %v695_v10 = vor.u32 1.1754944e-38, %v694_v3  ;;  %vm693_vm10 = vcmp.eq.f32.partialorder %v692_v4, 8.507059e+37 }
 0x9ec   :  { %v1469_v48 = vpop.eup %1468 }
 0x9ed   :  { %v1471_v50 = vpop.eup %1470  ;;  %v747_v51 = vmul.f32 %v1469_v48, %v745_v46  ;;  %vm752_vm3 = vweird.f32 %v1469_v48 }
 0x9ee   :  { %v684_v52 = vmul.f32 %v1471_v50, %v682_v47  ;;  %vm689_vm15 = vweird.f32 %v1471_v50  ;;  %vm753_vm2 = vmor %vm751_vm6, %vm752_vm3  ;;  %vm851_vm6 = vcmp.gt.s32.totalorder %v1720_v33, 5 }
 0x9ef   :  { %v748_v55 = vsub.f32 1.0, %v747_v51  ;;  %vm690_vm5 = vmor %vm688_vm4, %vm689_vm15 }
 0x9f0   :  { %v685_v39 = vsub.f32 1.0, %v684_v52 }
 0x9f1   :  { %v749_v57 = vmul.f32 %v1469_v48, %v748_v55 }
 0x9f2   :  { %v686_v58 = vmul.f32 %v1471_v50, %v685_v39 }
 0x9f3   :  { %v750_v60 = vadd.f32 %v1469_v48, %v749_v57 }
 0x9f4   :  { %v687_v63 = vadd.f32 %v1471_v50, %v686_v58 }
 0x9f5   :  { %v754_v45 = vsel %vm753_vm2, %v1469_v48, %v750_v60 }
 0x9f6   :  { %v691_v8 = vsel %vm690_vm5, %v1471_v50, %v687_v63  ;;  %v759_v54 = vsel %vm756_vm9, %v758_v5, %v754_v45  ;;  %v912_v45 = vsel %vm851_vm6, 1, %v1619_v0 }
 0x9f7   :  { %v696_v15 = vsel %vm693_vm10, %v695_v10, %v691_v8  ;;  %v762_v30 = vmul.f32 %v759_v54, %v1956_v61 }
 0x9f8   :  { %v699_v23 = vmul.f32 %v696_v15, %v1967_v22 }
 0xa54   :  { %v765_v11 = vpop.permute.xlu0 %764 }
 0xa55   :  { %v767_v14 = vmul.f32 %v765_v11, %v759_v54  ;;  %v702_v56 = vpop.permute.xlu1 %701 }
 0xa56   :  { %v704_v17 = vmul.f32 %v702_v56, %v696_v15 }
 0xa57   :  { %769 = vrot.lane.b32.xlu2 %v767_v14, %s1620_s27 }
 0xa58   :  { %706 = vrot.lane.b32.xlu0 %v704_v17, %s1620_s27 }
 0xa5f   :  { %781 = vperm.xlu2 %1399, %v779_v18  }
 0xab1   :  { %v770_v19 = vpop.permute.xlu2 %769 }
 0xab2   :  { %v1959_v38 = vadd.f32 %v770_v19, %v762_v30 }
 0xab4   :  { %1472 = vtanh.f32 %v1959_v38 }
 0xab9   :  { %v1974_v25 = vpop.permute.xlu2 %781 }
 0xaba   :  { %v1473_v21 = vpop.eup %1472  ;;  %vm783_vm12 = vcmp.eq.s32.totalorder %v1974_v25, 1 }
 0xabb   :  { %775 = vrot.lane.b32.xlu1 %v1473_v21, %s1617_s21 }
 0xaca   :  { %v707_v49 = vpop.permute.xlu0 %706 }
 0xacb   :  { %v1970_v12 = vadd.f32 %v707_v49, %v699_v23  ;;  %v2009_v23 = vsel %vm783_vm12, %v1959_v38, %v1956_v61 }
 0xacd   :  { %1474 = vtanh.f32 %v1970_v12 }
 0xad3   :  { %v1475_v24 = vpop.eup %1474 }
 0xad4   :  { %712 = vrot.lane.b32.xlu0 %v1475_v24, %s1617_s21 }
 0xb2d   :  { %v776_v26 = vpop.permute.xlu1 %775 }
 0xb2e   :  { %v778_v27 = vmul.f32 %v776_v26, %v759_v54 }
 0xb30   :  { %v1980_v1 = vsel %vm783_vm12, %v778_v27, %v1920_v31 }
 0xb31   :  { %787 = vrot.lane.b32.xlu2 %v1980_v1, %s1620_s27  ;;  %v854_v13 = vpack.c.bf16 %v1980_v1, %v1980_v1 }
 0xb33   :  { %856 = vrot.lane.b32.xlu1 %v854_v13, %s1620_s27  ;;  %v2020_v13 = vsel %vm650_vm14, %v1970_v12, %v1967_v22 }
 0xb46   :  { %v713_v59 = vpop.permute.xlu0 %712 }
 0xb47   :  { %v715_v9 = vmul.f32 %v713_v59, %v696_v15 }
 0xb49   :  { %v1990_v28 = vsel %vm650_vm14, %v715_v9, %v1930_v20 }
 0xb4a   :  { %791 = vrot.lane.b32.xlu0 %v1990_v28, %s1617_s21 }
 0xb8b   :  { %v788_v29 = vpop.permute.xlu2 %787 }
 0xba5   :  { %v857_v31 = vpop.permute.xlu1 %856 }
 0xba6   :  { %1359 = vmatmul.msk.bf16.vlgmr.msrb.gmra.mxu3 %vm171_vm7, %v857_v31 }
 0xbbc   :  { %v792_v32 = vpop.permute.xlu0 %791 }
 0xbbd   :  { %v794_v34 = vsel %vm171_vm7, %v788_v29, %v792_v32 }
 0xbbe   :  { %v795_v37 = vpack.c.bf16 %v794_v34, %v794_v34 }
 0xbc0   :  { %1357 = vmatmul.msk.bf16.vlgmr.msrb.gmra.mxu1 %vm263_vm8, %v795_v37 }
 0xc29   :  { %v870_v40 = vpop.f32.mrf.mxu3 }
 0xc2a   :  { %v874_v41 = vadd.f32 %v870_v40, %v125_v2 }
 0xc2c   :  { %1476 = vtanh.f32 %v874_v41  ;;  %v1360_v47 = vmul.f32 -1.442695, %v874_v41 }
 0xc31   :  { %v872_v20 = vpop.f32.mrf.mxu3 }
 0xc32   :  { %v1477_v6 = vpop.eup %1476 }
 0xc33   :  { %897 = vrot.lane.b32.xlu2 %v1477_v6, %s1617_s21 }
 0xc3d   :  { %v808_v42 = vpop.f32.mrf.mxu1 }
 0xc3e   :  { %v809_v43 = vadd.f32 %v1772_v53, %v808_v42 }
 0xc40   :  { %1478 = vtanh.f32 %v809_v43  ;;  %v1358_v63 = vmul.f32 -1.442695, %v809_v43 }
 0xc41   :  { %1480 = vpow2.f32 %v1360_v47 }
 0xc45   :  { %v810_v44 = vpop.f32.mrf.mxu1 }
 0xc46   :  { %v1479_v46 = vpop.eup %1478  ;;  %v2056_v44 = vld [vmem:[%s2175_s5] ss:$0 sm:$0xff] }
 0xc47   :  { %834 = vrot.lane.b32.xlu1 %v1479_v46, %s1617_s21  ;;  %v1481_v48 = vpop.eup %1480 }
 0xc48   :  { %v878_v50 = vadd.f32 1.0, %v1481_v48 }
 0xc4a   :  { %1482 = vrcp.f32 %v878_v50  ;;  %v890_v57 = vand.u32 2147483648, %v878_v50  ;;  %vm884_vm13 = vweird.f32 %v878_v50  ;;  %v888_v58 = vand.u32 2147483647, %v878_v50 }
 0xc4b   :  { %1484 = vpow2.f32 %v1358_v63 }
 0xc4c   :  { %v891_v62 = vor.u32 1.1754944e-38, %v890_v57  ;;  %vm889_vm15 = vcmp.eq.f32.partialorder %v888_v58, 8.507059e+37 }
 0xc50   :  { %v1483_v7 = vpop.eup %1482 }
 0xc51   :  { %v880_v51 = vmul.f32 %v1483_v7, %v878_v50  ;;  %vm885_vm1 = vweird.f32 %v1483_v7  ;;  %v1485_v5 = vpop.eup %1484 }
 0xc52   :  { %vm886_vm3 = vmor %vm884_vm13, %vm885_vm1  ;;  %v815_v8 = vadd.f32 1.0, %v1485_v5 }
 0xc53   :  { %v881_v52 = vsub.f32 1.0, %v880_v51 }
 0xc54   :  { %1486 = vrcp.f32 %v815_v8  ;;  %v827_v15 = vand.u32 2147483648, %v815_v8  ;;  %vm821_vm4 = vweird.f32 %v815_v8  ;;  %v825_v17 = vand.u32 2147483647, %v815_v8 }
 0xc55   :  { %v882_v55 = vmul.f32 %v1483_v7, %v881_v52 }
 0xc56   :  { %v828_v30 = vor.u32 1.1754944e-38, %v827_v15  ;;  %vm826_vm9 = vcmp.eq.f32.partialorder %v825_v17, 8.507059e+37 }
 0xc57   :  { %v883_v39 = vadd.f32 %v1483_v7, %v882_v55 }
 0xc59   :  { %v887_v60 = vsel %vm886_vm3, %v1483_v7, %v883_v39 }
 0xc5a   :  { %v892_v3 = vsel %vm889_vm15, %v891_v62, %v887_v60  ;;  %v1487_v10 = vpop.eup %1486 }
 0xc5b   :  { %v817_v11 = vmul.f32 %v1487_v10, %v815_v8  ;;  %vm822_vm2 = vweird.f32 %v1487_v10  ;;  %v895_v49 = vmul.f32 %v892_v3, %v2009_v23 }
 0xc5c   :  { %vm823_vm5 = vmor %vm821_vm4, %vm822_vm2 }
 0xc5d   :  { %v818_v54 = vsub.f32 1.0, %v817_v11 }
 0xc5f   :  { %v819_v14 = vmul.f32 %v1487_v10, %v818_v54 }
 0xc61   :  { %v820_v56 = vadd.f32 %v1487_v10, %v819_v14  ;;  %v2066_v14 = vld [vmem:[%s2171_s1] sm:$0xff] }
 0xc62   :  { %vm984_vm13 = vcmp.gt.s32.totalorder %v2066_v14, 6 }
 0xc63   :  { %v824_v18 = vsel %vm823_vm5, %v1487_v10, %v820_v56  ;;  %v1045_v15 = vsel %vm984_vm13, 1, %v1619_v0 }
 0xc64   :  { %v829_v19 = vsel %vm826_vm9, %v828_v30, %v824_v18 }
 0xc65   :  { %v832_v59 = vmul.f32 %v829_v19, %v2020_v13 }
 0xc8d   :  { %v898_v36 = vpop.permute.xlu2 %897 }
 0xc8e   :  { %v900_v4 = vmul.f32 %v898_v36, %v892_v3 }
 0xc90   :  { %902 = vrot.lane.b32.xlu1 %v900_v4, %s1620_s27 }
 0xc98   :  { %914 = vperm.xlu1 %1398, %v912_v45  }
 0xcb9   :  { %v835_v33 = vpop.permute.xlu1 %834 }
 0xcba   :  { %v837_v21 = vmul.f32 %v835_v33, %v829_v19 }
 0xcbc   :  { %839 = vrot.lane.b32.xlu0 %v837_v21, %s1620_s27 }
 0xd02   :  { %v903_v24 = vpop.permute.xlu1 %902 }
 0xd03   :  { %v2012_v26 = vadd.f32 %v903_v24, %v895_v49 }
 0xd05   :  { %1488 = vtanh.f32 %v2012_v26 }
 0xd0a   :  { %v2027_v31 = vpop.permute.xlu1 %914 }
 0xd0b   :  { %v1489_v27 = vpop.eup %1488  ;;  %vm916_vm10 = vcmp.eq.s32.totalorder %v2027_v31, 1 }
 0xd0c   :  { %908 = vrot.lane.b32.xlu0 %v1489_v27, %s1617_s21 }
 0xd2e   :  { %v840_v61 = vpop.permute.xlu0 %839 }
 0xd2f   :  { %v2023_v38 = vadd.f32 %v840_v61, %v832_v59 }
 0xd31   :  { %1490 = vtanh.f32 %v2023_v38 }
 0xd37   :  { %v1491_v9 = vpop.eup %1490 }
 0xd38   :  { %845 = vrot.lane.b32.xlu2 %v1491_v9, %s1617_s21 }
 0xd7e   :  { %v909_v29 = vpop.permute.xlu0 %908 }
 0xd7f   :  { %v911_v32 = vmul.f32 %v909_v29, %v892_v3 }
 0xd81   :  { %v2033_v16 = vsel %vm916_vm10, %v911_v32, %v1980_v1  ;;  %v72_v1 = vld [vmem:[#allocation3 + $0x30] sm:$0xff] }
 0xd82   :  { %920 = vrot.lane.b32.xlu2 %v2033_v16, %s1620_s27  ;;  %v987_v22 = vpack.c.bf16 %v2033_v16, %v2033_v16  ;;  %v77_v2 = vpack.c.bf16 %v73_v35, %v72_v1 }
 0xd84   :  { %989 = vrot.lane.b32.xlu1 %v987_v22, %s1620_s27  ;;  %1315 = vmatmul.msk.bf16.gmra.mxu0 %vm90_vm0, %v77_v2  ;;  %v2075_v22 = vsel %vm916_vm10, %v2012_v26, %v2009_v23  ;;  %v2086_v2 = vsel %vm783_vm12, %v2023_v38, %v2020_v13 }
 0xd92   :  { %v846_v12 = vpop.permute.xlu2 %845 }
 0xd93   :  { %v848_v34 = vmul.f32 %v846_v12, %v829_v19 }
 0xd95   :  { %v2043_v37 = vsel %vm783_vm12, %v848_v34, %v1990_v28 }
 0xd96   :  { %924 = vrot.lane.b32.xlu0 %v2043_v37, %s1617_s21 }
 0xddc   :  { %v921_v41 = vpop.permute.xlu2 %920 }
 0xdf6   :  { %v990_v40 = vpop.permute.xlu1 %989 }
 0xdf7   :  { %1363 = vmatmul.msk.bf16.vlgmr.msrb.gmra.mxu0 %vm171_vm7, %v990_v40 }
 0xe01   :  { %v127_v28 = vpop.f32.mrf.mxu0 }
 0xe02   :  { %v128_v46 = vadd.f32 %v2056_v44, %v127_v28 }
 0xe08   :  { %v925_v20 = vpop.permute.xlu0 %924 }
 0xe09   :  { %v927_v6 = vsel %vm171_vm7, %v921_v41, %v925_v20  ;;  %v2051_v43 = vpop.f32.mrf.mxu0 }
 0xe0a   :  { %v928_v42 = vpack.c.bf16 %v927_v6, %v927_v6 }
 0xe0c   :  { %1361 = vmatmul.msk.bf16.vlgmr.msrb.gmra.mxu2 %vm263_vm8, %v928_v42 }
 0xe74   :  { %v1003_v47 = vpop.f32.mrf.mxu0 }
 0xe75   :  { %v1007_v48 = vadd.f32 %v1003_v47, %v128_v46 }
 0xe77   :  { %1492 = vtanh.f32 %v1007_v48  ;;  %v1364_v57 = vmul.f32 -1.442695, %v1007_v48 }
 0xe7c   :  { %v1005_v50 = vpop.f32.mrf.mxu0 }
 0xe7d   :  { %v1493_v7 = vpop.eup %1492 }
 0xe7e   :  { %1030 = vrot.lane.b32.xlu2 %v1493_v7, %s1617_s21 }
 0xe8f   :  { %v941_v51 = vpop.f32.mrf.mxu2 }
 0xe90   :  { %v942_v52 = vadd.f32 %v1772_v53, %v941_v51 }
 0xe92   :  { %1494 = vtanh.f32 %v942_v52  ;;  %v1362_v56 = vmul.f32 -1.442695, %v942_v52  ;;  %v2119_v52 = vld [vmem:[%s2176_s6] ss:$0 sm:$0xff] }
 0xe93   :  { %1496 = vpow2.f32 %v1364_v57 }
 0xe97   :  { %v943_v55 = vpop.f32.mrf.mxu2 }
 0xe98   :  { %v1495_v39 = vpop.eup %1494  ;;  %v130_v55 = vadd.f32 %v2056_v44, %v2051_v43 }
 0xe99   :  { %967 = vrot.lane.b32.xlu0 %v1495_v39, %s1617_s21  ;;  %v1497_v58 = vpop.eup %1496 }
 0xe9a   :  { %v1011_v60 = vadd.f32 1.0, %v1497_v58 }
 0xe9c   :  { %1498 = vrcp.f32 %v1011_v60  ;;  %v1023_v45 = vand.u32 2147483648, %v1011_v60  ;;  %vm1017_vm14 = vweird.f32 %v1011_v60  ;;  %v1021_v5 = vand.u32 2147483647, %v1011_v60 }
 0xe9d   :  { %1500 = vpow2.f32 %v1362_v56 }
 0xe9e   :  { %v1024_v8 = vor.u32 1.1754944e-38, %v1023_v45  ;;  %vm1022_vm1 = vcmp.eq.f32.partialorder %v1021_v5, 8.507059e+37 }
 0xea2   :  { %v1499_v62 = vpop.eup %1498 }
 0xea3   :  { %v1013_v63 = vmul.f32 %v1499_v62, %v1011_v60  ;;  %vm1018_vm0 = vweird.f32 %v1499_v62  ;;  %v1501_v17 = vpop.eup %1500 }
 0xea4   :  { %vm1019_vm11 = vmor %vm1017_vm14, %vm1018_vm0  ;;  %v948_v18 = vadd.f32 1.0, %v1501_v17 }
 0xea5   :  { %v1014_v36 = vsub.f32 1.0, %v1013_v63 }
 0xea6   :  { %1502 = vrcp.f32 %v948_v18  ;;  %v960_v24 = vand.u32 2147483648, %v948_v18  ;;  %vm954_vm15 = vweird.f32 %v948_v18  ;;  %v958_v27 = vand.u32 2147483647, %v948_v18 }
 0xea7   :  { %v1015_v3 = vmul.f32 %v1499_v62, %v1014_v36 }
 0xea8   :  { %v961_v61 = vor.u32 1.1754944e-38, %v960_v24  ;;  %vm959_vm2 = vcmp.eq.f32.partialorder %v958_v27, 8.507059e+37 }
 0xea9   :  { %v1016_v4 = vadd.f32 %v1499_v62, %v1015_v3 }
 0xeab   :  { %v1020_v53 = vsel %vm1019_vm11, %v1499_v62, %v1016_v4 }
 0xeac   :  { %v1025_v10 = vsel %vm1022_vm1, %v1024_v8, %v1020_v53  ;;  %v1503_v30 = vpop.eup %1502 }
 0xead   :  { %v950_v33 = vmul.f32 %v1503_v30, %v948_v18  ;;  %vm955_vm3 = vweird.f32 %v1503_v30  ;;  %v1028_v12 = vmul.f32 %v1025_v10, %v2075_v22 }
 0xeae   :  { %vm956_vm6 = vmor %vm954_vm15, %vm955_vm3  ;;  %vm1117_vm3 = vcmp.gt.s32.totalorder %v2066_v14, 7 }
 0xeaf   :  { %v951_v19 = vsub.f32 1.0, %v950_v33 }
 0xeb1   :  { %v952_v21 = vmul.f32 %v1503_v30, %v951_v19 }
 0xeb3   :  { %v953_v49 = vadd.f32 %v1503_v30, %v952_v21 }
 0xeb5   :  { %v957_v59 = vsel %vm956_vm6, %v1503_v30, %v953_v49 }
 0xeb6   :  { %v962_v29 = vsel %vm959_vm2, %v961_v61, %v957_v59 }
 0xeb7   :  { %v965_v40 = vmul.f32 %v962_v29, %v2086_v2 }
 0xed8   :  { %v1031_v11 = vpop.permute.xlu2 %1030 }
 0xed9   :  { %v1033_v54 = vmul.f32 %v1031_v11, %v1025_v10 }
 0xedb   :  { %1035 = vrot.lane.b32.xlu1 %v1033_v54, %s1620_s27 }
 0xee3   :  { %1047 = vperm.xlu1 %1398, %v1045_v15  }
 0xf0b   :  { %v968_v9 = vpop.permute.xlu0 %967 }
 0xf0c   :  { %v970_v32 = vmul.f32 %v968_v9, %v962_v29 }
 0xf0e   :  { %972 = vrot.lane.b32.xlu2 %v970_v32, %s1620_s27 }
 0xf4d   :  { %v1036_v34 = vpop.permute.xlu1 %1035 }
 0xf4e   :  { %v2078_v1 = vadd.f32 %v1036_v34, %v1028_v12 }
 0xf50   :  { %1504 = vtanh.f32 %v2078_v1 }
 0xf55   :  { %v2093_v20 = vpop.permute.xlu1 %1047 }
 0xf56   :  { %v1505_v35 = vpop.eup %1504  ;;  %vm1049_vm4 = vcmp.eq.s32.totalorder %v2093_v20, 1 }
 0xf57   :  { %1041 = vrot.lane.b32.xlu0 %v1505_v35, %s1617_s21  ;;  %v1178_v35 = vsel %vm1117_vm3, 1, %v1619_v0  ;;  %v1051_v14 = vsel %vm1049_vm4, %v2078_v1, %v2075_v22 }
 0xf68   :  { %v973_v23 = vpop.permute.xlu2 %972 }
 0xf69   :  { %v2089_v26 = vadd.f32 %v973_v23, %v965_v40 }
 0xf6b   :  { %1506 = vtanh.f32 %v2089_v26  ;;  %v983_v40 = vsel %vm916_vm10, %v2089_v26, %v2086_v2 }
 0xf71   :  { %v1507_v41 = vpop.eup %1506 }
 0xf72   :  { %978 = vrot.lane.b32.xlu2 %v1507_v41, %s1617_s21 }
 0xfc9   :  { %v1042_v6 = vpop.permute.xlu0 %1041 }
 0xfca   :  { %v1044_v42 = vmul.f32 %v1042_v6, %v1025_v10 }
 0xfcc   :  { %v979_v28 = vpop.permute.xlu2 %978  ;;  %v2099_v25 = vsel %vm1049_vm4, %v1044_v42, %v2033_v16 }
 0xfcd   :  { %v981_v13 = vmul.f32 %v979_v28, %v962_v29  ;;  %1053 = vrot.lane.b32.xlu1 %v2099_v25, %s1620_s27  ;;  %v1120_v38 = vpack.c.bf16 %v2099_v25, %v2099_v25 }
 0xfcf   :  { %1122 = vrot.lane.b32.xlu0 %v1120_v38, %s1620_s27  ;;  %v2109_v46 = vsel %vm916_vm10, %v981_v13, %v2043_v37 }
 0xfd0   :  { %1057 = vrot.lane.b32.xlu2 %v2109_v46, %s1617_s21 }
0x102a   :  { %v1058_v47 = vpop.permute.xlu2 %1057 }
0x103f   :  { %v1054_v16 = vpop.permute.xlu1 %1053 }
0x1040   :  { %v1060_v48 = vsel %vm171_vm7, %v1054_v16, %v1058_v47 }
0x1041   :  { %v1061_v50 = vpack.c.bf16 %v1060_v48, %v1060_v48  ;;  %v1123_v7 = vpop.permute.xlu0 %1122 }
0x1042   :  { %1367 = vmatmul.msk.bf16.vlgmr.msra.gmra.mxu3 %vm171_vm7, %v1123_v7 }
0x1043   :  { %1365 = vmatmul.msk.bf16.vlgmr.msra.gmra.mxu1 %vm263_vm8, %v1061_v50 }
0x10c0   :  { %v1074_v51 = vpop.f32.mrf.mxu1 }
0x10c1   :  { %v1075_v37 = vadd.f32 %v2119_v52, %v1074_v51 }
0x10c3   :  { %1508 = vtanh.f32 %v1075_v37  ;;  %v1366_v36 = vmul.f32 -1.442695, %v1075_v37 }
0x10c5   :  { %v1136_v39 = vpop.f32.mrf.mxu3 }
0x10c6   :  { %v1140_v57 = vadd.f32 %v1136_v39, %v130_v55 }
0x10c8   :  { %1510 = vtanh.f32 %v1140_v57  ;;  %v1076_v58 = vpop.f32.mrf.mxu1  ;;  %v1368_v3 = vmul.f32 -1.442695, %v1140_v57 }
0x10c9   :  { %v1509_v60 = vpop.eup %1508  ;;  %1512 = vpow2.f32 %v1366_v36 }
0x10ca   :  { %1100 = vrot.lane.b32.xlu0 %v1509_v60, %s1617_s21  ;;  %1514 = vpow2.f32 %v1368_v3 }
0x10cd   :  { %v1138_v62 = vpop.f32.mrf.mxu3 }
0x10ce   :  { %v1511_v63 = vpop.eup %1510 }
0x10cf   :  { %1163 = vrot.lane.b32.xlu1 %v1511_v63, %s1617_s21  ;;  %v1513_v4 = vpop.eup %1512 }
0x10d0   :  { %v1081_v45 = vadd.f32 1.0, %v1513_v4  ;;  %v1515_v5 = vpop.eup %1514 }
0x10d1   :  { %v1144_v43 = vadd.f32 1.0, %v1515_v5 }
0x10d2   :  { %1516 = vrcp.f32 %v1081_v45  ;;  %v1093_v17 = vand.u32 2147483648, %v1081_v45  ;;  %vm1087_vm5 = vweird.f32 %v1081_v45  ;;  %v1091_v30 = vand.u32 2147483647, %v1081_v45 }
0x10d3   :  { %1518 = vrcp.f32 %v1144_v43  ;;  %v1156_v49 = vand.u32 2147483648, %v1144_v43  ;;  %vm1150_vm11 = vweird.f32 %v1144_v43  ;;  %v1154_v59 = vand.u32 2147483647, %v1144_v43 }
0x10d4   :  { %v1094_v19 = vor.u32 1.1754944e-38, %v1093_v17  ;;  %vm1092_vm14 = vcmp.eq.f32.partialorder %v1091_v30, 8.507059e+37  ;;  %v1387_v17 = vld [vmem:[%s2177_s7] sm:$0xff] }
0x10d5   :  { %v1157_v29 = vor.u32 1.1754944e-38, %v1156_v49  ;;  %vm1155_vm13 = vcmp.eq.f32.partialorder %v1154_v59, 8.507059e+37 }
0x10d8   :  { %v1517_v44 = vpop.eup %1516 }
0x10d9   :  { %v1083_v53 = vmul.f32 %v1517_v44, %v1081_v45  ;;  %v1519_v8 = vpop.eup %1518  ;;  %vm1088_vm12 = vweird.f32 %v1517_v44 }
0x10da   :  { %v1146_v11 = vmul.f32 %v1519_v8, %v1144_v43  ;;  %vm1089_vm9 = vmor %vm1087_vm5, %vm1088_vm12  ;;  %vm1151_vm0 = vweird.f32 %v1519_v8 }
0x10db   :  { %v1084_v10 = vsub.f32 1.0, %v1083_v53  ;;  %vm1152_vm1 = vmor %vm1150_vm11, %vm1151_vm0 }
0x10dc   :  { %v1147_v56 = vsub.f32 1.0, %v1146_v11 }
0x10dd   :  { %v1085_v54 = vmul.f32 %v1517_v44, %v1084_v10 }
0x10de   :  { %v1148_v18 = vmul.f32 %v1519_v8, %v1147_v56 }
0x10df   :  { %v1086_v15 = vadd.f32 %v1517_v44, %v1085_v54 }
0x10e0   :  { %v1149_v21 = vadd.f32 %v1519_v8, %v1148_v18 }
0x10e1   :  { %v1090_v33 = vsel %vm1089_vm9, %v1517_v44, %v1086_v15  ;;  %v1388_v15 = vld [vmem:[%s2177_s7 + $0x8] sm:$0xff]  ;;  %s1297_s7 = sshll.u32 %s2179_s9, 4  ;;  %s1298_s7 = int_to_ptr.hbm [resolvable:$true] %s1297_s7 }
0x10e2   :  { %v1095_v27 = vsel %vm1092_vm14, %v1094_v19, %v1090_v33  ;;  %v1153_v9 = vsel %vm1152_vm1, %v1519_v8, %v1149_v21  ;;  %1281 = vmatpush.bf16.msra.mxu0 %v1388_v15  ;;  %v1403_v21 = vld [vmem:[%s2178_s8] ss:$0 sm:$0xff] }
0x10e3   :  { %v1158_v12 = vsel %vm1155_vm13, %v1157_v29, %v1153_v9  ;;  %v1098_v23 = vmul.f32 %v1095_v27, %v983_v40 }
0x10e4   :  { %v1161_v28 = vmul.f32 %v1158_v12, %v1051_v14 }
0x10e6   :  { %1282 = vmatpush.bf16.msra.mxu0 %v1387_v17 }
0x113c   :  { %v1101_v24 = vpop.permute.xlu0 %1100 }
0x113d   :  { %v1103_v61 = vmul.f32 %v1101_v24, %v1095_v27 }
0x113f   :  { %1105 = vrot.lane.b32.xlu2 %v1103_v61, %s1620_s27 }
0x1141   :  { %v1164_v32 = vpop.permute.xlu1 %1163 }
0x1142   :  { %v1166_v34 = vmul.f32 %v1164_v32, %v1158_v12 }
0x1144   :  { %1168 = vrot.lane.b32.xlu0 %v1166_v34, %s1620_s27 }
0x114c   :  { %1180 = vperm.xlu0 %1400, %v1178_v35  }
0x1199   :  { %v1106_v41 = vpop.permute.xlu2 %1105 }
0x119a   :  { %v1108_v6 = vadd.f32 %v1106_v41, %v1098_v23 }
0x119c   :  { %1520 = vtanh.f32 %v1108_v6  ;;  %v1116_v8 = vsel %vm1049_vm4, %v1108_v6, %v983_v40 }
0x11a2   :  { %v1521_v42 = vpop.eup %1520 }
0x11a3   :  { %1111 = vrot.lane.b32.xlu1 %v1521_v42, %s1617_s21 }
0x11b6   :  { %v1169_v0 = vpop.permute.xlu0 %1168 }
0x11b7   :  { %v1171_v13 = vadd.f32 %v1169_v0, %v1161_v28 }
0x11b9   :  { %1522 = vtanh.f32 %v1171_v13 }
0x11be   :  { %v1181_v26 = vpop.permute.xlu0 %1180 }
0x11bf   :  { %v1523_v38 = vpop.eup %1522  ;;  %vm1182_vm10 = vcmp.eq.s32.totalorder %v1181_v26, 1 }
0x11c0   :  { %1174 = vrot.lane.b32.xlu2 %v1523_v38, %s1617_s21 }
0x1215   :  { %v1112_v31 = vpop.permute.xlu1 %1111 }
0x1216   :  { %v1114_v2 = vmul.f32 %v1112_v31, %v1095_v27 }
0x1218   :  { %v1115_v47 = vsel %vm1049_vm4, %v1114_v2, %v2109_v46  ;;  %vm1288_vm4 = vcmask 64512  }
0x1219   :  { %1189 = vrot.lane.b32.xlu2 %v1115_v47, %s1617_s21 }
0x121a   :  { %v1175_v16 = vpop.permute.xlu2 %1174 }
0x121b   :  { %v1177_v48 = vmul.f32 %v1175_v16, %v1158_v12 }
0x121d   :  { %v1183_v22 = vsel %vm1182_vm10, %v1177_v48, %v2099_v25 }
0x121e   :  { %1185 = vrot.lane.b32.xlu1 %v1183_v22, %s1620_s27 }
0x1273   :  { %v1190_v1 = vpop.permute.xlu2 %1189 }
0x1290   :  { %v1186_v50 = vpop.permute.xlu1 %1185 }
0x1291   :  { %v1192_v7 = vsel %vm171_vm7, %v1186_v50, %v1190_v1 }
0x1292   :  { %v1193_v51 = vpack.c.bf16 %v1192_v7, %v1192_v7 }
0x1294   :  { %1369 = vmatmul.msk.bf16.vlgmr.msra.gmra.mxu2 %vm263_vm8, %v1193_v51 }
0x1317   :  { %v1206_v37 = vpop.f32.mrf.mxu2 }
0x1318   :  { %v1207_v46 = vadd.f32 %v2119_v52, %v1206_v37 }
0x131a   :  { %1524 = vtanh.f32 %v1207_v46  ;;  %v1370_v57 = vmul.f32 -1.442695, %v1207_v46 }
0x131c   :  { %1526 = vpow2.f32 %v1370_v57 }
0x131f   :  { %v1208_v55 = vpop.f32.mrf.mxu2 }
0x1320   :  { %v1525_v39 = vpop.eup %1524 }
0x1321   :  { %1232 = vrot.lane.b32.xlu1 %v1525_v39, %s1617_s21 }
0x1322   :  { %v1527_v25 = vpop.eup %1526 }
0x1323   :  { %v1213_v58 = vadd.f32 1.0, %v1527_v25 }
0x1325   :  { %1528 = vrcp.f32 %v1213_v58  ;;  %v1225_v4 = vand.u32 2147483648, %v1213_v58  ;;  %vm1219_vm8 = vweird.f32 %v1213_v58  ;;  %v1223_v45 = vand.u32 2147483647, %v1213_v58 }
0x1327   :  { %v1226_v5 = vor.u32 1.1754944e-38, %v1225_v4  ;;  %vm1224_vm2 = vcmp.eq.f32.partialorder %v1223_v45, 8.507059e+37 }
0x132b   :  { %v1529_v60 = vpop.eup %1528 }
0x132c   :  { %v1215_v62 = vmul.f32 %v1529_v60, %v1213_v58  ;;  %vm1220_vm15 = vweird.f32 %v1529_v60 }
0x132d   :  { %vm1221_vm6 = vmor %vm1219_vm8, %vm1220_vm15 }
0x132e   :  { %v1216_v63 = vsub.f32 1.0, %v1215_v62 }
0x1330   :  { %v1217_v36 = vmul.f32 %v1529_v60, %v1216_v63 }
0x1332   :  { %v1218_v3 = vadd.f32 %v1529_v60, %v1217_v36 }
0x1334   :  { %v1222_v52 = vsel %vm1221_vm6, %v1529_v60, %v1218_v3 }
0x1335   :  { %v1227_v44 = vsel %vm1224_vm2, %v1226_v5, %v1222_v52 }
0x1336   :  { %v1230_v10 = vmul.f32 %v1227_v44, %v1116_v8 }
0x1393   :  { %v1233_v43 = vpop.permute.xlu1 %1232 }
0x1394   :  { %v1235_v53 = vmul.f32 %v1233_v43, %v1227_v44 }
0x1396   :  { %1237 = vrot.lane.b32.xlu2 %v1235_v53, %s1620_s27 }
0x13f0   :  { %v1238_v11 = vpop.permute.xlu2 %1237 }
0x13f1   :  { %v1240_v54 = vadd.f32 %v1238_v11, %v1230_v10 }
0x13f3   :  { %1530 = vtanh.f32 %v1240_v54 }
0x13f9   :  { %v1531_v56 = vpop.eup %1530 }
0x13fa   :  { %1243 = vrot.lane.b32.xlu0 %v1531_v56, %s1617_s21  ;;  %s1295_s21 = sshll.u32 %s1621_s20, 4  ;;  %s1296_s21 = int_to_ptr.vmem [resolvable:$true] %s1295_s21 }
0x146c   :  { %v1244_v18 = vpop.permute.xlu0 %1243 }
0x146d   :  { %v1246_v20 = vmul.f32 %v1244_v18, %v1227_v44 }
0x146f   :  { %v1247_v30 = vsel %vm1182_vm10, %v1246_v20, %v1115_v47 }
0x1470   :  { %v1248_v33 = vpack.c.bf16 %v1247_v30, %v1247_v30 }
0x1472   :  { %1258 = vrot.lane.b32.xlu1 %v1248_v33, %s1620_s27 }
0x14e4   :  { %v1259_v19 = vpop.permute.xlu1 %1258 }
0x14e5   :  { %1379 = vmatmul.msk.bf16.vlgmr.msra.gmra.mxu0 %vm171_vm7, %v1259_v19 }
0x1562   :  { %v1284_v49 = vpop.f32.mrf.mxu0 }
0x1563   :  { %v1285_v24 = vadd.f32 %v1403_v21, %v1284_v49 }
0x1565   :  { %1289 = vst.msk [vmem:[#allocation8] sm:$0xff] %vm1288_vm4, %v1285_v24 }
0x1566   :  { %1300 = dma.vmem_to_hbm [thread:$0]  %s1296_s21, 128, %s1298_s7, [#allocation5]  }
0x156a   :  { %v1286_v27 = vpop.f32.mrf.mxu0 }
0x156b   :  { %1611 = dma.done.wait [#allocation5], 128  }
0x156c   :  { %1612 = vsyncadd [#allocation5], 4294967168 }
0x156d   :  { %1305 = vsyncpa [#allocation4], 1 }
0x156e   :  { %1306 = vsyncpa [#allocation7], 1 }
0x156f   :  { %1307 = vsyncpa [#allocation5], 1 }

</bundles_post_ra>
